<compile_context>
chip_gen: v6e
topology: v6e:2x2x1
jax: 0.10.0
libtpu: 0.0.40
codegen_flags: <defaults>
</compile_context>

<pallas_src>
from functools import partial

import numpy as np
import jax
import jax.numpy as jnp
from jax.experimental import pallas as pl
from jax.experimental.pallas import tpu as pltpu


def _graph_kernel(N, C, x_ref, wcw_ref, ph_ref, w_m_ref, w_h_ref, w_oh_ref,
                  b_ref, gamma_ref, out_ref):
    """One grid step: all N node updates for one (batch, lane-tile) block.

    x_ref / out_ref blocks are (1, N, C, T): channels on sublanes, spatial tile
    on lanes, so every 1x1 conv is an MXU matmul W(out, in) @ x(in, T) and every
    store is a full lane-dense (C, T) slab.
    """
    f32 = jnp.float32
    gamma = gamma_ref[0, 0]

    wcw = wcw_ref[...]                                   # (N-1, C) grouped conv weights
    w_m = w_m_ref[...]                                   # (3C, C)  fused [z;r;o] on m_t
    w_h = w_h_ref[...]                                   # (2C, C)  fused [z;r]   on h_t
    w_oh = w_oh_ref[...]                                 # (C, C)   out gate on r*h_t
    b = b_ref[...]                                       # (3C, 1)  fused biases [bz;br;bo]
    ph = [ph_ref[:, p:p + 1] for p in range(N - 1)]      # (C,1) one-hot of c' % (N-1)

    # Grouped-conv projections A[n][g] = wcw[g] . x[n], computed once per grid step
    # and reused by every node (x is DMA'd exactly once -- no per-node refetch).
    A = [jnp.dot(wcw, x_ref[0, n], preferred_element_type=f32) for n in range(N)]

    for idx in range(N):                                 # N small & static -> unrolled
        h_t = x_ref[0, idx]                              # (C, T)
        others = [j for j in range(N) if j != idx]

        # Edge gates: raw[g] = wcw[g] . (h_t - x[j_g]);  s[g] = sigmoid(raw[g]).
        s = [jax.nn.sigmoid(A[idx][g:g + 1, :] - A[others[g]][g:g + 1, :])
             for g in range(N - 1)]                      # each (1, T)

        # Message aggregation with the PyTorch repeat(...).view() interleave:
        # message channel (group g, row c') is gated by s[(g*C + c') % (N-1)].
        # Implemented with (C,1)x(1,T) broadcast-multiplies and per-group (C, T)
        # accumulation -- no MXU gather, no ((N-1)*C, T) intermediates.
        m_t = None
        for g in range(N - 1):
            wgt = None
            for p in range(N - 1):
                term = ph[p] * s[(g * C + p) % (N - 1)]  # (C, T)
                wgt = term if wgt is None else wgt + term
            msg = x_ref[0, others[g]] * wgt              # (C, T)
            m_t = msg if m_t is None else m_t + msg

        # ConvGRU cell (kernel_size=1) with fused gate weights (no [m, h] concat).
        gm = jnp.dot(w_m, m_t, preferred_element_type=f32) + b   # (3C, T)
        gh = jnp.dot(w_h, h_t, preferred_element_type=f32)       # (2C, T)
        z = jax.nn.sigmoid(gm[:C] + gh[:C])
        r = jax.nn.sigmoid(gm[C:2 * C] + gh[C:2 * C])
        cand = jnp.tanh(gm[2 * C:] +
                        jnp.dot(w_oh, r * h_t, preferred_element_type=f32))
        h_new = h_t * (1.0 - z) + cand * z
        out_ref[0, idx] = (h_new * gamma + h_t).astype(out_ref.dtype)


def _vmem_capacity_bytes():
    """Per-core VMEM capacity (falls back to a conservative v7x-sized 64 MiB)."""
    try:
        return int(getattr(pltpu.get_tpu_info(), "vmem_capacity_bytes"))
    except Exception:
        return 64 << 20


def _pick_lane_tile(HW, N, C, vmem_cap):
    """Largest lane tile (multiple of 128, divides HW) that fits the VMEM budget."""
    if HW % 128 != 0:
        return HW                      # single full-extent (masked) lane block
    budget = vmem_cap // 3             # headroom for weights / intermediates
    per_lane = 2 * (2 * N * C * 4)     # x + out blocks, double-buffered, f32
    t_cap = max(128, (budget // per_lane) // 128 * 128)
    for cand in (4096, 2048, 1024, 512, 256, 128):
        if cand <= t_cap and HW % cand == 0:
            return cand
    return 128


def graph_model_forward(x_bnchw, params):
    """x_bnchw: (B, N, C, H, W) float32 -> (B, N, C, H, W) float32."""
    B, N, C, H, W = x_bnchw.shape
    assert N >= 2, "GraphModel needs at least two nodes"
    HW = H * W

    # No global transpose: (B,N,C,H,W) -> (B,N,C,H*W) is a free contiguous reshape.
    # Channels -> sublanes, H*W -> lanes, batch / lane tiles -> grid.
    x = x_bnchw.reshape(B, N, C, HW).astype(jnp.float32)

    wcw = params["wcw"].astype(jnp.float32)                         # (N-1, C)
    Wr, Wz, Wo = params["wr"], params["wz"], params["wo"]           # (2C, C), (in, out)
    # Fused GRU gate weights in (out, in) orientation; row order [z, r, o].
    w_m = jnp.concatenate([Wz[:C].T, Wr[:C].T, Wo[:C].T], axis=0).astype(jnp.float32)
    w_h = jnp.concatenate([Wz[C:].T, Wr[C:].T], axis=0).astype(jnp.float32)
    w_oh = Wo[C:].T.astype(jnp.float32)
    b_all = jnp.concatenate([params["bz"], params["br"], params["bo"]],
                            axis=1).reshape(3 * C, 1).astype(jnp.float32)   # (3C, 1)

    # repeat(...).view() interleave helper: phase_onehot[c', p] = 1 iff c' % (N-1) == p.
    ph_np = (np.arange(C)[:, None] % (N - 1)
             == np.arange(N - 1)[None, :]).astype(np.float32)
    phase_onehot = jnp.asarray(ph_np)                               # (C, N-1)

    gamma = params["gamma"].reshape(1, 1).astype(jnp.float32)

    vmem_cap = _vmem_capacity_bytes()
    T = _pick_lane_tile(HW, N, C, vmem_cap)
    num_tiles = (HW + T - 1) // T
    blocks_bytes = 2 * (2 * N * C * T * 4)                          # x + out, 2x buffered
    vmem_limit = int(min(vmem_cap, max(32 << 20, blocks_bytes + (8 << 20))))

    kern = partial(_graph_kernel, N, C)
    out = pl.pallas_call(
        kern,
        out_shape=jax.ShapeDtypeStruct((B, N, C, HW), jnp.float32),
        grid=(num_tiles, B),
        in_specs=[
            pl.BlockSpec((1, N, C, T), lambda t, b: (b, 0, 0, t)),   # all nodes, one tile
            pl.BlockSpec((N - 1, C), lambda t, b: (0, 0)),           # grouped conv weights
            pl.BlockSpec((C, N - 1), lambda t, b: (0, 0)),           # interleave one-hot
            pl.BlockSpec((3 * C, C), lambda t, b: (0, 0)),           # fused gate W on m_t
            pl.BlockSpec((2 * C, C), lambda t, b: (0, 0)),           # fused gate W on h_t
            pl.BlockSpec((C, C), lambda t, b: (0, 0)),               # out-gate W on r*h_t
            pl.BlockSpec((3 * C, 1), lambda t, b: (0, 0)),           # fused biases
            pl.BlockSpec(memory_space=pltpu.MemorySpace.SMEM),       # gamma scalar
        ],
        out_specs=pl.BlockSpec((1, N, C, T), lambda t, b: (b, 0, 0, t)),
        compiler_params=pltpu.CompilerParams(
            dimension_semantics=("parallel", "parallel"),
            vmem_limit_bytes=vmem_limit),
    )(x, wcw, phase_onehot, w_m, w_h, w_oh, b_all, gamma)

    return out.reshape(B, N, C, H, W)


def reference_forward(x, params):
    """Pure-JAX mirror of the PyTorch forward (NCHW), for correctness checking."""
    B, N, C, H, W = x.shape
    Wcw = params["wcw"]
    Wr, Wz, Wo = params["wr"], params["wz"], params["wo"]
    br, bz, bo = params["br"], params["bz"], params["bo"]
    gamma = params["gamma"][0, 0]
    preds = []
    for idx in range(N):
        h_t = x[:, idx]                                              # (B, C, H, W)
        h_n = jnp.concatenate([x[:, j] for j in range(N) if j != idx], axis=1)
        h_t_m = jnp.tile(h_t, (1, N - 1, 1, 1))
        diff = (h_t_m - h_n).reshape(B, N - 1, C, H, W)
        raw = jnp.einsum("bgchw,gc->bghw", diff, Wcw)                # (B, N-1, H, W)
        wgt = jnp.tile(raw[:, None], (1, C, 1, 1, 1)).reshape(B, (N - 1) * C, H, W)
        msg = h_n * jax.nn.sigmoid(wgt)
        m_t = msg.reshape(B, N - 1, C, H, W).sum(axis=1)             # (B, C, H, W)
        stacked = jnp.concatenate([m_t, h_t], axis=1)                # (B, 2C, H, W)
        update = jax.nn.sigmoid(jnp.einsum("bihw,io->bohw", stacked, Wz)
                                + bz.reshape(1, C, 1, 1))
        reset = jax.nn.sigmoid(jnp.einsum("bihw,io->bohw", stacked, Wr)
                               + br.reshape(1, C, 1, 1))
        cand_in = jnp.concatenate([m_t, h_t * reset], axis=1)
        cand = jnp.tanh(jnp.einsum("bihw,io->bohw", cand_in, Wo)
                        + bo.reshape(1, C, 1, 1))
        h_new = h_t * (1.0 - update) + cand * update
        preds.append(h_new * gamma + h_t)
    return jnp.stack(preds, axis=1)


if __name__ == "__main__":
    # Small shapes consistent with the module: batch=2, N=3 nodes, chnn=32, 8x16
    # spatial (H*W = 128 -> lane-dense layout with zero wrapper transposes).
    B, N, C, H, W = 2, 3, 32, 8, 16

    key = jax.random.PRNGKey(0)
    k_x, k_cw, k_r, k_z, k_o, k_br, k_bz, k_bo = jax.random.split(key, 8)

    x = jax.random.normal(k_x, (B, N, C, H, W), dtype=jnp.float32)

    params = {
        # Conv2d(chnn*(N-1), N-1, 1, groups=N-1, bias=False) -> per-group (C,) weights
        "wcw": 0.1 * jax.random.normal(k_cw, (N - 1, C), dtype=jnp.float32),
        # ConvGRU 1x1 gate weights, stored in matmul orientation (2C_in, C_out)
        "wr": 0.1 * jax.random.normal(k_r, (2 * C, C), dtype=jnp.float32),
        "wz": 0.1 * jax.random.normal(k_z, (2 * C, C), dtype=jnp.float32),
        "wo": 0.1 * jax.random.normal(k_o, (2 * C, C), dtype=jnp.float32),
        "br": 0.1 * jax.random.normal(k_br, (1, C), dtype=jnp.float32),
        "bz": 0.1 * jax.random.normal(k_bz, (1, C), dtype=jnp.float32),
        "bo": 0.1 * jax.random.normal(k_bo, (1, C), dtype=jnp.float32),
        # PyTorch init is zeros(1) (identity output); nonzero here so the GRU path matters.
        "gamma": jnp.full((1, 1), 0.25, dtype=jnp.float32),
    }

    out = jax.block_until_ready(graph_model_forward(x, params))
    ref = jax.block_until_ready(reference_forward(x, params))

    assert out.shape == (B, N, C, H, W)
    # Both paths use default (bf16 MXU) matmul precision -> allow small numeric slack.
    np.testing.assert_allclose(np.asarray(out), np.asarray(ref), rtol=2e-3, atol=2e-3)

    print("KERNEL_OK")
</pallas_src>

<mosaic_0001>
module attributes {stable_mosaic.version = 11 : i64} {
  func.func @_graph_kernel(%arg0: i32, %arg1: i32, %arg2: memref<1x3x32x128xf32, #tpu.memory_space<vmem>>, %arg3: memref<2x32xf32, #tpu.memory_space<vmem>>, %arg4: memref<32x2xf32, #tpu.memory_space<vmem>>, %arg5: memref<96x32xf32, #tpu.memory_space<vmem>>, %arg6: memref<64x32xf32, #tpu.memory_space<vmem>>, %arg7: memref<32x32xf32, #tpu.memory_space<vmem>>, %arg8: memref<96x1xf32, #tpu.memory_space<vmem>>, %arg9: memref<1x1xf32, #tpu.memory_space<smem>>, %arg10: memref<1x3x32x128xf32, #tpu.memory_space<vmem>>) attributes {dimension_semantics = [#tpu.dimension_semantics<parallel>, #tpu.dimension_semantics<parallel>], iteration_bounds = array<i64: 1, 2>, scalar_prefetch = 0 : i64, scratch_operands = 0 : i64, tpu.core_type = #tpu.core_type<tc>, window_params = [{transform_indices = @transform_0, window_bounds = array<i64: 1, 3, 32, 128>}, {pipeline_mode = #tpu.pipeline_mode<synchronous>, transform_indices = @transform_1, window_bounds = array<i64: 2, 32>}, {pipeline_mode = #tpu.pipeline_mode<synchronous>, transform_indices = @transform_2, window_bounds = array<i64: 32, 2>}, {pipeline_mode = #tpu.pipeline_mode<synchronous>, transform_indices = @transform_3, window_bounds = array<i64: 96, 32>}, {pipeline_mode = #tpu.pipeline_mode<synchronous>, transform_indices = @transform_4, window_bounds = array<i64: 64, 32>}, {pipeline_mode = #tpu.pipeline_mode<synchronous>, transform_indices = @transform_5, window_bounds = array<i64: 32, 32>}, {pipeline_mode = #tpu.pipeline_mode<synchronous>, transform_indices = @transform_6, window_bounds = array<i64: 96, 1>}, {transform_indices = @transform_7, window_bounds = array<i64: 1, 1>}, {transform_indices = @transform_8, window_bounds = array<i64: 1, 3, 32, 128>}]} {
    %c0 = arith.constant 0 : index
    %c0_0 = arith.constant 0 : index
    %0 = memref.load %arg9[%c0, %c0_0] : memref<1x1xf32, #tpu.memory_space<smem>>
    %c0_1 = arith.constant 0 : index
    %c0_2 = arith.constant 0 : index
    %1 = vector.load %arg3[%c0_1, %c0_2] : memref<2x32xf32, #tpu.memory_space<vmem>>, vector<2x32xf32>
    %c0_3 = arith.constant 0 : index
    %c0_4 = arith.constant 0 : index
    %2 = vector.load %arg5[%c0_3, %c0_4] : memref<96x32xf32, #tpu.memory_space<vmem>>, vector<96x32xf32>
    %c0_5 = arith.constant 0 : index
    %c0_6 = arith.constant 0 : index
    %3 = vector.load %arg6[%c0_5, %c0_6] : memref<64x32xf32, #tpu.memory_space<vmem>>, vector<64x32xf32>
    %c0_7 = arith.constant 0 : index
    %c0_8 = arith.constant 0 : index
    %4 = vector.load %arg7[%c0_7, %c0_8] : memref<32x32xf32, #tpu.memory_space<vmem>>, vector<32x32xf32>
    %c0_9 = arith.constant 0 : index
    %c0_10 = arith.constant 0 : index
    %5 = vector.load %arg8[%c0_9, %c0_10] : memref<96x1xf32, #tpu.memory_space<vmem>>, vector<96x1xf32>
    %c0_11 = arith.constant 0 : index
    %c0_12 = arith.constant 0 : index
    %6 = vector.load %arg4[%c0_11, %c0_12] : memref<32x2xf32, #tpu.memory_space<vmem>>, vector<32x1xf32>
    %c0_13 = arith.constant 0 : index
    %c1 = arith.constant 1 : index
    %7 = vector.load %arg4[%c0_13, %c1] : memref<32x2xf32, #tpu.memory_space<vmem>>, vector<32x1xf32>
    %c0_14 = arith.constant 0 : index
    %c0_15 = arith.constant 0 : index
    %c0_16 = arith.constant 0 : index
    %c0_17 = arith.constant 0 : index
    %8 = vector.load %arg2[%c0_14, %c0_15, %c0_16, %c0_17] : memref<1x3x32x128xf32, #tpu.memory_space<vmem>>, vector<1x1x32x128xf32>
    %9 = vector.shape_cast %8 : vector<1x1x32x128xf32> to vector<32x128xf32>
    %cst = arith.constant dense<0.000000e+00> : vector<2x128xf32>
    %10 = tpu.matmul %1, %9, %cst {dimension_numbers = #tpu.dot_dimension_numbers<[1], [0], [0], [1], [0, 0, 1, 1], [], []>} : vector<2x32xf32>, vector<32x128xf32>, vector<2x128xf32> -> vector<2x128xf32>
    %c0_18 = arith.constant 0 : index
    %c1_19 = arith.constant 1 : index
    %c0_20 = arith.constant 0 : index
    %c0_21 = arith.constant 0 : index
    %11 = vector.load %arg2[%c0_18, %c1_19, %c0_20, %c0_21] : memref<1x3x32x128xf32, #tpu.memory_space<vmem>>, vector<1x1x32x128xf32>
    %12 = vector.shape_cast %11 : vector<1x1x32x128xf32> to vector<32x128xf32>
    %cst_22 = arith.constant dense<0.000000e+00> : vector<2x128xf32>
    %13 = tpu.matmul %1, %12, %cst_22 {dimension_numbers = #tpu.dot_dimension_numbers<[1], [0], [0], [1], [0, 0, 1, 1], [], []>} : vector<2x32xf32>, vector<32x128xf32>, vector<2x128xf32> -> vector<2x128xf32>
    %c0_23 = arith.constant 0 : index
    %c2 = arith.constant 2 : index
    %c0_24 = arith.constant 0 : index
    %c0_25 = arith.constant 0 : index
    %14 = vector.load %arg2[%c0_23, %c2, %c0_24, %c0_25] : memref<1x3x32x128xf32, #tpu.memory_space<vmem>>, vector<1x1x32x128xf32>
    %15 = vector.shape_cast %14 : vector<1x1x32x128xf32> to vector<32x128xf32>
    %cst_26 = arith.constant dense<0.000000e+00> : vector<2x128xf32>
    %16 = tpu.matmul %1, %15, %cst_26 {dimension_numbers = #tpu.dot_dimension_numbers<[1], [0], [0], [1], [0, 0, 1, 1], [], []>} : vector<2x32xf32>, vector<32x128xf32>, vector<2x128xf32> -> vector<2x128xf32>
    %c0_27 = arith.constant 0 : index
    %c0_28 = arith.constant 0 : index
    %c0_29 = arith.constant 0 : index
    %c0_30 = arith.constant 0 : index
    %17 = vector.load %arg2[%c0_27, %c0_28, %c0_29, %c0_30] : memref<1x3x32x128xf32, #tpu.memory_space<vmem>>, vector<1x1x32x128xf32>
    %18 = vector.shape_cast %17 : vector<1x1x32x128xf32> to vector<32x128xf32>
    %19 = vector.extract_strided_slice %10 {offsets = [0, 0], sizes = [1, 128], strides = [1, 1]} : vector<2x128xf32> to vector<1x128xf32>
    %20 = vector.extract_strided_slice %13 {offsets = [0, 0], sizes = [1, 128], strides = [1, 1]} : vector<2x128xf32> to vector<1x128xf32>
    %21 = arith.subf %19, %20 : vector<1x128xf32>
    %22 = arith.negf %21 : vector<1x128xf32>
    %23 = math.exp %22 : vector<1x128xf32>
    %cst_31 = arith.constant 1.000000e+00 : f32
    %24 = vector.broadcast %cst_31 : f32 to vector<1x128xf32>
    %25 = arith.addf %24, %23 : vector<1x128xf32>
    %26 = arith.divf %24, %25 : vector<1x128xf32>
    %27 = vector.extract_strided_slice %10 {offsets = [1, 0], sizes = [1, 128], strides = [1, 1]} : vector<2x128xf32> to vector<1x128xf32>
    %28 = vector.extract_strided_slice %16 {offsets = [1, 0], sizes = [1, 128], strides = [1, 1]} : vector<2x128xf32> to vector<1x128xf32>
    %29 = arith.subf %27, %28 : vector<1x128xf32>
    %30 = arith.negf %29 : vector<1x128xf32>
    %31 = math.exp %30 : vector<1x128xf32>
    %cst_32 = arith.constant 1.000000e+00 : f32
    %32 = vector.broadcast %cst_32 : f32 to vector<1x128xf32>
    %33 = arith.addf %32, %31 : vector<1x128xf32>
    %34 = arith.divf %32, %33 : vector<1x128xf32>
    %35 = vector.broadcast %6 : vector<32x1xf32> to vector<32x128xf32>
    %36 = vector.broadcast %26 : vector<1x128xf32> to vector<32x128xf32>
    %37 = arith.mulf %35, %36 : vector<32x128xf32>
    %38 = vector.broadcast %7 : vector<32x1xf32> to vector<32x128xf32>
    %39 = vector.broadcast %34 : vector<1x128xf32> to vector<32x128xf32>
    %40 = arith.mulf %38, %39 : vector<32x128xf32>
    %41 = arith.addf %37, %40 : vector<32x128xf32>
    %c0_33 = arith.constant 0 : index
    %c1_34 = arith.constant 1 : index
    %c0_35 = arith.constant 0 : index
    %c0_36 = arith.constant 0 : index
    %42 = vector.load %arg2[%c0_33, %c1_34, %c0_35, %c0_36] : memref<1x3x32x128xf32, #tpu.memory_space<vmem>>, vector<1x1x32x128xf32>
    %43 = vector.shape_cast %42 : vector<1x1x32x128xf32> to vector<32x128xf32>
    %44 = arith.mulf %43, %41 : vector<32x128xf32>
    %45 = vector.broadcast %6 : vector<32x1xf32> to vector<32x128xf32>
    %46 = vector.broadcast %26 : vector<1x128xf32> to vector<32x128xf32>
    %47 = arith.mulf %45, %46 : vector<32x128xf32>
    %48 = vector.broadcast %7 : vector<32x1xf32> to vector<32x128xf32>
    %49 = vector.broadcast %34 : vector<1x128xf32> to vector<32x128xf32>
    %50 = arith.mulf %48, %49 : vector<32x128xf32>
    %51 = arith.addf %47, %50 : vector<32x128xf32>
    %c0_37 = arith.constant 0 : index
    %c2_38 = arith.constant 2 : index
    %c0_39 = arith.constant 0 : index
    %c0_40 = arith.constant 0 : index
    %52 = vector.load %arg2[%c0_37, %c2_38, %c0_39, %c0_40] : memref<1x3x32x128xf32, #tpu.memory_space<vmem>>, vector<1x1x32x128xf32>
    %53 = vector.shape_cast %52 : vector<1x1x32x128xf32> to vector<32x128xf32>
    %54 = arith.mulf %53, %51 : vector<32x128xf32>
    %55 = arith.addf %44, %54 : vector<32x128xf32>
    %cst_41 = arith.constant dense<0.000000e+00> : vector<96x128xf32>
    %56 = tpu.matmul %2, %55, %cst_41 {dimension_numbers = #tpu.dot_dimension_numbers<[1], [0], [0], [1], [0, 0, 1, 1], [], []>} : vector<96x32xf32>, vector<32x128xf32>, vector<96x128xf32> -> vector<96x128xf32>
    %57 = vector.broadcast %5 : vector<96x1xf32> to vector<96x128xf32>
    %58 = arith.addf %56, %57 : vector<96x128xf32>
    %cst_42 = arith.constant dense<0.000000e+00> : vector<64x128xf32>
    %59 = tpu.matmul %3, %18, %cst_42 {dimension_numbers = #tpu.dot_dimension_numbers<[1], [0], [0], [1], [0, 0, 1, 1], [], []>} : vector<64x32xf32>, vector<32x128xf32>, vector<64x128xf32> -> vector<64x128xf32>
    %60 = vector.extract_strided_slice %58 {offsets = [0, 0], sizes = [32, 128], strides = [1, 1]} : vector<96x128xf32> to vector<32x128xf32>
    %61 = vector.extract_strided_slice %59 {offsets = [0, 0], sizes = [32, 128], strides = [1, 1]} : vector<64x128xf32> to vector<32x128xf32>
    %62 = arith.addf %60, %61 : vector<32x128xf32>
    %63 = arith.negf %62 : vector<32x128xf32>
    %64 = math.exp %63 : vector<32x128xf32>
    %cst_43 = arith.constant 1.000000e+00 : f32
    %65 = vector.broadcast %cst_43 : f32 to vector<32x128xf32>
    %66 = arith.addf %65, %64 : vector<32x128xf32>
    %67 = arith.divf %65, %66 : vector<32x128xf32>
    %68 = vector.extract_strided_slice %58 {offsets = [32, 0], sizes = [32, 128], strides = [1, 1]} : vector<96x128xf32> to vector<32x128xf32>
    %69 = vector.extract_strided_slice %59 {offsets = [32, 0], sizes = [32, 128], strides = [1, 1]} : vector<64x128xf32> to vector<32x128xf32>
    %70 = arith.addf %68, %69 : vector<32x128xf32>
    %71 = arith.negf %70 : vector<32x128xf32>
    %72 = math.exp %71 : vector<32x128xf32>
    %cst_44 = arith.constant 1.000000e+00 : f32
    %73 = vector.broadcast %cst_44 : f32 to vector<32x128xf32>
    %74 = arith.addf %73, %72 : vector<32x128xf32>
    %75 = arith.divf %73, %74 : vector<32x128xf32>
    %76 = vector.extract_strided_slice %58 {offsets = [64, 0], sizes = [32, 128], strides = [1, 1]} : vector<96x128xf32> to vector<32x128xf32>
    %77 = arith.mulf %75, %18 : vector<32x128xf32>
    %cst_45 = arith.constant dense<0.000000e+00> : vector<32x128xf32>
    %78 = tpu.matmul %4, %77, %cst_45 {dimension_numbers = #tpu.dot_dimension_numbers<[1], [0], [0], [1], [0, 0, 1, 1], [], []>} : vector<32x32xf32>, vector<32x128xf32>, vector<32x128xf32> -> vector<32x128xf32>
    %79 = arith.addf %76, %78 : vector<32x128xf32>
    %80 = math.tanh %79 : vector<32x128xf32>
    %cst_46 = arith.constant 1.000000e+00 : f32
    %81 = vector.broadcast %cst_46 : f32 to vector<32x128xf32>
    %82 = arith.subf %81, %67 : vector<32x128xf32>
    %83 = arith.mulf %18, %82 : vector<32x128xf32>
    %84 = arith.mulf %80, %67 : vector<32x128xf32>
    %85 = arith.addf %83, %84 : vector<32x128xf32>
    %86 = vector.broadcast %0 : f32 to vector<32x128xf32>
    %87 = arith.mulf %85, %86 : vector<32x128xf32>
    %88 = arith.addf %87, %18 : vector<32x128xf32>
    %c0_47 = arith.constant 0 : index
    %c0_48 = arith.constant 0 : index
    %c0_49 = arith.constant 0 : index
    %c0_50 = arith.constant 0 : index
    %89 = vector.load %arg10[%c0_47, %c0_48, %c0_49, %c0_50] : memref<1x3x32x128xf32, #tpu.memory_space<vmem>>, vector<1x1x32x128xf32>
    %90 = vector.shape_cast %89 : vector<1x1x32x128xf32> to vector<32x128xf32>
    %91 = vector.shape_cast %88 : vector<32x128xf32> to vector<1x1x32x128xf32>
    tpu.vector_store %arg10[%c0_47, %c0_48, %c0_49, %c0_50], %91 {strides = array<i32>} : memref<1x3x32x128xf32, #tpu.memory_space<vmem>>, vector<1x1x32x128xf32>,
    %c0_51 = arith.constant 0 : index
    %c1_52 = arith.constant 1 : index
    %c0_53 = arith.constant 0 : index
    %c0_54 = arith.constant 0 : index
    %92 = vector.load %arg2[%c0_51, %c1_52, %c0_53, %c0_54] : memref<1x3x32x128xf32, #tpu.memory_space<vmem>>, vector<1x1x32x128xf32>
    %93 = vector.shape_cast %92 : vector<1x1x32x128xf32> to vector<32x128xf32>
    %94 = vector.extract_strided_slice %13 {offsets = [0, 0], sizes = [1, 128], strides = [1, 1]} : vector<2x128xf32> to vector<1x128xf32>
    %95 = vector.extract_strided_slice %10 {offsets = [0, 0], sizes = [1, 128], strides = [1, 1]} : vector<2x128xf32> to vector<1x128xf32>
    %96 = arith.subf %94, %95 : vector<1x128xf32>
    %97 = arith.negf %96 : vector<1x128xf32>
    %98 = math.exp %97 : vector<1x128xf32>
    %cst_55 = arith.constant 1.000000e+00 : f32
    %99 = vector.broadcast %cst_55 : f32 to vector<1x128xf32>
    %100 = arith.addf %99, %98 : vector<1x128xf32>
    %101 = arith.divf %99, %100 : vector<1x128xf32>
    %102 = vector.extract_strided_slice %13 {offsets = [1, 0], sizes = [1, 128], strides = [1, 1]} : vector<2x128xf32> to vector<1x128xf32>
    %103 = vector.extract_strided_slice %16 {offsets = [1, 0], sizes = [1, 128], strides = [1, 1]} : vector<2x128xf32> to vector<1x128xf32>
    %104 = arith.subf %102, %103 : vector<1x128xf32>
    %105 = arith.negf %104 : vector<1x128xf32>
    %106 = math.exp %105 : vector<1x128xf32>
    %cst_56 = arith.constant 1.000000e+00 : f32
    %107 = vector.broadcast %cst_56 : f32 to vector<1x128xf32>
    %108 = arith.addf %107, %106 : vector<1x128xf32>
    %109 = arith.divf %107, %108 : vector<1x128xf32>
    %110 = vector.broadcast %6 : vector<32x1xf32> to vector<32x128xf32>
    %111 = vector.broadcast %101 : vector<1x128xf32> to vector<32x128xf32>
    %112 = arith.mulf %110, %111 : vector<32x128xf32>
    %113 = vector.broadcast %7 : vector<32x1xf32> to vector<32x128xf32>
    %114 = vector.broadcast %109 : vector<1x128xf32> to vector<32x128xf32>
    %115 = arith.mulf %113, %114 : vector<32x128xf32>
    %116 = arith.addf %112, %115 : vector<32x128xf32>
    %c0_57 = arith.constant 0 : index
    %c0_58 = arith.constant 0 : index
    %c0_59 = arith.constant 0 : index
    %c0_60 = arith.constant 0 : index
    %117 = vector.load %arg2[%c0_57, %c0_58, %c0_59, %c0_60] : memref<1x3x32x128xf32, #tpu.memory_space<vmem>>, vector<1x1x32x128xf32>
    %118 = vector.shape_cast %117 : vector<1x1x32x128xf32> to vector<32x128xf32>
    %119 = arith.mulf %118, %116 : vector<32x128xf32>
    %120 = vector.broadcast %6 : vector<32x1xf32> to vector<32x128xf32>
    %121 = vector.broadcast %101 : vector<1x128xf32> to vector<32x128xf32>
    %122 = arith.mulf %120, %121 : vector<32x128xf32>
    %123 = vector.broadcast %7 : vector<32x1xf32> to vector<32x128xf32>
    %124 = vector.broadcast %109 : vector<1x128xf32> to vector<32x128xf32>
    %125 = arith.mulf %123, %124 : vector<32x128xf32>
    %126 = arith.addf %122, %125 : vector<32x128xf32>
    %c0_61 = arith.constant 0 : index
    %c2_62 = arith.constant 2 : index
    %c0_63 = arith.constant 0 : index
    %c0_64 = arith.constant 0 : index
    %127 = vector.load %arg2[%c0_61, %c2_62, %c0_63, %c0_64] : memref<1x3x32x128xf32, #tpu.memory_space<vmem>>, vector<1x1x32x128xf32>
    %128 = vector.shape_cast %127 : vector<1x1x32x128xf32> to vector<32x128xf32>
    %129 = arith.mulf %128, %126 : vector<32x128xf32>
    %130 = arith.addf %119, %129 : vector<32x128xf32>
    %cst_65 = arith.constant dense<0.000000e+00> : vector<96x128xf32>
    %131 = tpu.matmul %2, %130, %cst_65 {dimension_numbers = #tpu.dot_dimension_numbers<[1], [0], [0], [1], [0, 0, 1, 1], [], []>} : vector<96x32xf32>, vector<32x128xf32>, vector<96x128xf32> -> vector<96x128xf32>
    %132 = vector.broadcast %5 : vector<96x1xf32> to vector<96x128xf32>
    %133 = arith.addf %131, %132 : vector<96x128xf32>
    %cst_66 = arith.constant dense<0.000000e+00> : vector<64x128xf32>
    %134 = tpu.matmul %3, %93, %cst_66 {dimension_numbers = #tpu.dot_dimension_numbers<[1], [0], [0], [1], [0, 0, 1, 1], [], []>} : vector<64x32xf32>, vector<32x128xf32>, vector<64x128xf32> -> vector<64x128xf32>
    %135 = vector.extract_strided_slice %133 {offsets = [0, 0], sizes = [32, 128], strides = [1, 1]} : vector<96x128xf32> to vector<32x128xf32>
    %136 = vector.extract_strided_slice %134 {offsets = [0, 0], sizes = [32, 128], strides = [1, 1]} : vector<64x128xf32> to vector<32x128xf32>
    %137 = arith.addf %135, %136 : vector<32x128xf32>
    %138 = arith.negf %137 : vector<32x128xf32>
    %139 = math.exp %138 : vector<32x128xf32>
    %cst_67 = arith.constant 1.000000e+00 : f32
    %140 = vector.broadcast %cst_67 : f32 to vector<32x128xf32>
    %141 = arith.addf %140, %139 : vector<32x128xf32>
    %142 = arith.divf %140, %141 : vector<32x128xf32>
    %143 = vector.extract_strided_slice %133 {offsets = [32, 0], sizes = [32, 128], strides = [1, 1]} : vector<96x128xf32> to vector<32x128xf32>
    %144 = vector.extract_strided_slice %134 {offsets = [32, 0], sizes = [32, 128], strides = [1, 1]} : vector<64x128xf32> to vector<32x128xf32>
    %145 = arith.addf %143, %144 : vector<32x128xf32>
    %146 = arith.negf %145 : vector<32x128xf32>
    %147 = math.exp %146 : vector<32x128xf32>
    %cst_68 = arith.constant 1.000000e+00 : f32
    %148 = vector.broadcast %cst_68 : f32 to vector<32x128xf32>
    %149 = arith.addf %148, %147 : vector<32x128xf32>
    %150 = arith.divf %148, %149 : vector<32x128xf32>
    %151 = vector.extract_strided_slice %133 {offsets = [64, 0], sizes = [32, 128], strides = [1, 1]} : vector<96x128xf32> to vector<32x128xf32>
    %152 = arith.mulf %150, %93 : vector<32x128xf32>
    %cst_69 = arith.constant dense<0.000000e+00> : vector<32x128xf32>
    %153 = tpu.matmul %4, %152, %cst_69 {dimension_numbers = #tpu.dot_dimension_numbers<[1], [0], [0], [1], [0, 0, 1, 1], [], []>} : vector<32x32xf32>, vector<32x128xf32>, vector<32x128xf32> -> vector<32x128xf32>
    %154 = arith.addf %151, %153 : vector<32x128xf32>
    %155 = math.tanh %154 : vector<32x128xf32>
    %cst_70 = arith.constant 1.000000e+00 : f32
    %156 = vector.broadcast %cst_70 : f32 to vector<32x128xf32>
    %157 = arith.subf %156, %142 : vector<32x128xf32>
    %158 = arith.mulf %93, %157 : vector<32x128xf32>
    %159 = arith.mulf %155, %142 : vector<32x128xf32>
    %160 = arith.addf %158, %159 : vector<32x128xf32>
    %161 = vector.broadcast %0 : f32 to vector<32x128xf32>
    %162 = arith.mulf %160, %161 : vector<32x128xf32>
    %163 = arith.addf %162, %93 : vector<32x128xf32>
    %c0_71 = arith.constant 0 : index
    %c1_72 = arith.constant 1 : index
    %c0_73 = arith.constant 0 : index
    %c0_74 = arith.constant 0 : index
    %164 = vector.load %arg10[%c0_71, %c1_72, %c0_73, %c0_74] : memref<1x3x32x128xf32, #tpu.memory_space<vmem>>, vector<1x1x32x128xf32>
    %165 = vector.shape_cast %164 : vector<1x1x32x128xf32> to vector<32x128xf32>
    %166 = vector.shape_cast %163 : vector<32x128xf32> to vector<1x1x32x128xf32>
    tpu.vector_store %arg10[%c0_71, %c1_72, %c0_73, %c0_74], %166 {strides = array<i32>} : memref<1x3x32x128xf32, #tpu.memory_space<vmem>>, vector<1x1x32x128xf32>,
    %c0_75 = arith.constant 0 : index
    %c2_76 = arith.constant 2 : index
    %c0_77 = arith.constant 0 : index
    %c0_78 = arith.constant 0 : index
    %167 = vector.load %arg2[%c0_75, %c2_76, %c0_77, %c0_78] : memref<1x3x32x128xf32, #tpu.memory_space<vmem>>, vector<1x1x32x128xf32>
    %168 = vector.shape_cast %167 : vector<1x1x32x128xf32> to vector<32x128xf32>
    %169 = vector.extract_strided_slice %16 {offsets = [0, 0], sizes = [1, 128], strides = [1, 1]} : vector<2x128xf32> to vector<1x128xf32>
    %170 = vector.extract_strided_slice %10 {offsets = [0, 0], sizes = [1, 128], strides = [1, 1]} : vector<2x128xf32> to vector<1x128xf32>
    %171 = arith.subf %169, %170 : vector<1x128xf32>
    %172 = arith.negf %171 : vector<1x128xf32>
    %173 = math.exp %172 : vector<1x128xf32>
    %cst_79 = arith.constant 1.000000e+00 : f32
    %174 = vector.broadcast %cst_79 : f32 to vector<1x128xf32>
    %175 = arith.addf %174, %173 : vector<1x128xf32>
    %176 = arith.divf %174, %175 : vector<1x128xf32>
    %177 = vector.extract_strided_slice %16 {offsets = [1, 0], sizes = [1, 128], strides = [1, 1]} : vector<2x128xf32> to vector<1x128xf32>
    %178 = vector.extract_strided_slice %13 {offsets = [1, 0], sizes = [1, 128], strides = [1, 1]} : vector<2x128xf32> to vector<1x128xf32>
    %179 = arith.subf %177, %178 : vector<1x128xf32>
    %180 = arith.negf %179 : vector<1x128xf32>
    %181 = math.exp %180 : vector<1x128xf32>
    %cst_80 = arith.constant 1.000000e+00 : f32
    %182 = vector.broadcast %cst_80 : f32 to vector<1x128xf32>
    %183 = arith.addf %182, %181 : vector<1x128xf32>
    %184 = arith.divf %182, %183 : vector<1x128xf32>
    %185 = vector.broadcast %6 : vector<32x1xf32> to vector<32x128xf32>
    %186 = vector.broadcast %176 : vector<1x128xf32> to vector<32x128xf32>
    %187 = arith.mulf %185, %186 : vector<32x128xf32>
    %188 = vector.broadcast %7 : vector<32x1xf32> to vector<32x128xf32>
    %189 = vector.broadcast %184 : vector<1x128xf32> to vector<32x128xf32>
    %190 = arith.mulf %188, %189 : vector<32x128xf32>
    %191 = arith.addf %187, %190 : vector<32x128xf32>
    %c0_81 = arith.constant 0 : index
    %c0_82 = arith.constant 0 : index
    %c0_83 = arith.constant 0 : index
    %c0_84 = arith.constant 0 : index
    %192 = vector.load %arg2[%c0_81, %c0_82, %c0_83, %c0_84] : memref<1x3x32x128xf32, #tpu.memory_space<vmem>>, vector<1x1x32x128xf32>
    %193 = vector.shape_cast %192 : vector<1x1x32x128xf32> to vector<32x128xf32>
    %194 = arith.mulf %193, %191 : vector<32x128xf32>
    %195 = vector.broadcast %6 : vector<32x1xf32> to vector<32x128xf32>
    %196 = vector.broadcast %176 : vector<1x128xf32> to vector<32x128xf32>
    %197 = arith.mulf %195, %196 : vector<32x128xf32>
    %198 = vector.broadcast %7 : vector<32x1xf32> to vector<32x128xf32>
    %199 = vector.broadcast %184 : vector<1x128xf32> to vector<32x128xf32>
    %200 = arith.mulf %198, %199 : vector<32x128xf32>
    %201 = arith.addf %197, %200 : vector<32x128xf32>
    %c0_85 = arith.constant 0 : index
    %c1_86 = arith.constant 1 : index
    %c0_87 = arith.constant 0 : index
    %c0_88 = arith.constant 0 : index
    %202 = vector.load %arg2[%c0_85, %c1_86, %c0_87, %c0_88] : memref<1x3x32x128xf32, #tpu.memory_space<vmem>>, vector<1x1x32x128xf32>
    %203 = vector.shape_cast %202 : vector<1x1x32x128xf32> to vector<32x128xf32>
    %204 = arith.mulf %203, %201 : vector<32x128xf32>
    %205 = arith.addf %194, %204 : vector<32x128xf32>
    %cst_89 = arith.constant dense<0.000000e+00> : vector<96x128xf32>
    %206 = tpu.matmul %2, %205, %cst_89 {dimension_numbers = #tpu.dot_dimension_numbers<[1], [0], [0], [1], [0, 0, 1, 1], [], []>} : vector<96x32xf32>, vector<32x128xf32>, vector<96x128xf32> -> vector<96x128xf32>
    %207 = vector.broadcast %5 : vector<96x1xf32> to vector<96x128xf32>
    %208 = arith.addf %206, %207 : vector<96x128xf32>
    %cst_90 = arith.constant dense<0.000000e+00> : vector<64x128xf32>
    %209 = tpu.matmul %3, %168, %cst_90 {dimension_numbers = #tpu.dot_dimension_numbers<[1], [0], [0], [1], [0, 0, 1, 1], [], []>} : vector<64x32xf32>, vector<32x128xf32>, vector<64x128xf32> -> vector<64x128xf32>
    %210 = vector.extract_strided_slice %208 {offsets = [0, 0], sizes = [32, 128], strides = [1, 1]} : vector<96x128xf32> to vector<32x128xf32>
    %211 = vector.extract_strided_slice %209 {offsets = [0, 0], sizes = [32, 128], strides = [1, 1]} : vector<64x128xf32> to vector<32x128xf32>
    %212 = arith.addf %210, %211 : vector<32x128xf32>
    %213 = arith.negf %212 : vector<32x128xf32>
    %214 = math.exp %213 : vector<32x128xf32>
    %cst_91 = arith.constant 1.000000e+00 : f32
    %215 = vector.broadcast %cst_91 : f32 to vector<32x128xf32>
    %216 = arith.addf %215, %214 : vector<32x128xf32>
    %217 = arith.divf %215, %216 : vector<32x128xf32>
    %218 = vector.extract_strided_slice %208 {offsets = [32, 0], sizes = [32, 128], strides = [1, 1]} : vector<96x128xf32> to vector<32x128xf32>
    %219 = vector.extract_strided_slice %209 {offsets = [32, 0], sizes = [32, 128], strides = [1, 1]} : vector<64x128xf32> to vector<32x128xf32>
    %220 = arith.addf %218, %219 : vector<32x128xf32>
    %221 = arith.negf %220 : vector<32x128xf32>
    %222 = math.exp %221 : vector<32x128xf32>
    %cst_92 = arith.constant 1.000000e+00 : f32
    %223 = vector.broadcast %cst_92 : f32 to vector<32x128xf32>
    %224 = arith.addf %223, %222 : vector<32x128xf32>
    %225 = arith.divf %223, %224 : vector<32x128xf32>
    %226 = vector.extract_strided_slice %208 {offsets = [64, 0], sizes = [32, 128], strides = [1, 1]} : vector<96x128xf32> to vector<32x128xf32>
    %227 = arith.mulf %225, %168 : vector<32x128xf32>
    %cst_93 = arith.constant dense<0.000000e+00> : vector<32x128xf32>
    %228 = tpu.matmul %4, %227, %cst_93 {dimension_numbers = #tpu.dot_dimension_numbers<[1], [0], [0], [1], [0, 0, 1, 1], [], []>} : vector<32x32xf32>, vector<32x128xf32>, vector<32x128xf32> -> vector<32x128xf32>
    %229 = arith.addf %226, %228 : vector<32x128xf32>
    %230 = math.tanh %229 : vector<32x128xf32>
    %cst_94 = arith.constant 1.000000e+00 : f32
    %231 = vector.broadcast %cst_94 : f32 to vector<32x128xf32>
    %232 = arith.subf %231, %217 : vector<32x128xf32>
    %233 = arith.mulf %168, %232 : vector<32x128xf32>
    %234 = arith.mulf %230, %217 : vector<32x128xf32>
    %235 = arith.addf %233, %234 : vector<32x128xf32>
    %236 = vector.broadcast %0 : f32 to vector<32x128xf32>
    %237 = arith.mulf %235, %236 : vector<32x128xf32>
    %238 = arith.addf %237, %168 : vector<32x128xf32>
    %c0_95 = arith.constant 0 : index
    %c2_96 = arith.constant 2 : index
    %c0_97 = arith.constant 0 : index
    %c0_98 = arith.constant 0 : index
    %239 = vector.load %arg10[%c0_95, %c2_96, %c0_97, %c0_98] : memref<1x3x32x128xf32, #tpu.memory_space<vmem>>, vector<1x1x32x128xf32>
    %240 = vector.shape_cast %239 : vector<1x1x32x128xf32> to vector<32x128xf32>
    %241 = vector.shape_cast %238 : vector<32x128xf32> to vector<1x1x32x128xf32>
    tpu.vector_store %arg10[%c0_95, %c2_96, %c0_97, %c0_98], %241 {strides = array<i32>} : memref<1x3x32x128xf32, #tpu.memory_space<vmem>>, vector<1x1x32x128xf32>,
    return
  }
  func.func @transform_0(%arg0: i32, %arg1: i32) -> (i32, i32, i32, i32) {
    %c0_i32 = arith.constant 0 : i32
    %c0_i32_0 = arith.constant 0 : i32
    %c0_i32_1 = arith.constant 0 : i32
    return %arg1, %c0_i32, %c0_i32_0, %arg0 : i32, i32, i32, i32
  }
  func.func @transform_1(%arg0: i32, %arg1: i32) -> (i32, i32) {
    %c0_i32 = arith.constant 0 : i32
    %c0_i32_0 = arith.constant 0 : i32
    %c0_i32_1 = arith.constant 0 : i32
    return %c0_i32, %c0_i32_0 : i32, i32
  }
  func.func @transform_2(%arg0: i32, %arg1: i32) -> (i32, i32) {
    %c0_i32 = arith.constant 0 : i32
    %c0_i32_0 = arith.constant 0 : i32
    %c0_i32_1 = arith.constant 0 : i32
    return %c0_i32, %c0_i32_0 : i32, i32
  }
  func.func @transform_3(%arg0: i32, %arg1: i32) -> (i32, i32) {
    %c0_i32 = arith.constant 0 : i32
    %c0_i32_0 = arith.constant 0 : i32
    %c0_i32_1 = arith.constant 0 : i32
    return %c0_i32, %c0_i32_0 : i32, i32
  }
  func.func @transform_4(%arg0: i32, %arg1: i32) -> (i32, i32) {
    %c0_i32 = arith.constant 0 : i32
    %c0_i32_0 = arith.constant 0 : i32
    %c0_i32_1 = arith.constant 0 : i32
    return %c0_i32, %c0_i32_0 : i32, i32
  }
  func.func @transform_5(%arg0: i32, %arg1: i32) -> (i32, i32) {
    %c0_i32 = arith.constant 0 : i32
    %c0_i32_0 = arith.constant 0 : i32
    %c0_i32_1 = arith.constant 0 : i32
    return %c0_i32, %c0_i32_0 : i32, i32
  }
  func.func @transform_6(%arg0: i32, %arg1: i32) -> (i32, i32) {
    %c0_i32 = arith.constant 0 : i32
    %c0_i32_0 = arith.constant 0 : i32
    %c0_i32_1 = arith.constant 0 : i32
    return %c0_i32, %c0_i32_0 : i32, i32
  }
  func.func @transform_7(%arg0: i32, %arg1: i32) -> (i32, i32) {
    %c0_i32 = arith.constant 0 : i32
    %c0_i32_0 = arith.constant 0 : i32
    %c0_i32_1 = arith.constant 0 : i32
    return %c0_i32, %c0_i32_0 : i32, i32
  }
  func.func @transform_8(%arg0: i32, %arg1: i32) -> (i32, i32, i32, i32) {
    %c0_i32 = arith.constant 0 : i32
    %c0_i32_0 = arith.constant 0 : i32
    %c0_i32_1 = arith.constant 0 : i32
    return %arg1, %c0_i32, %c0_i32_0, %arg0 : i32, i32, i32, i32
  }
}

</mosaic_0001>

<bundles_post_ra>
// kernel: tpu_custom_call.1
= control target key start
LH: loop header
LB: loop body
LE: loop exit
PB: predicated region body
PF: predicated region fallthrough
CT: control target
= control target key end

     0   :  { %s3970_s0 = inlined_call_operand.vmem [shape: f32[2,3,32,128], index: 0, kind: input, shape index: {}]   ;;  %s3971_s1 = inlined_call_operand.vmem [shape: f32[2,32], index: 1, kind: input, shape index: {}]   ;;  %s3972_s2 = inlined_call_operand.vmem [shape: f32[32,2], index: 2, kind: input, shape index: {}]   ;;  %s3973_s3 = inlined_call_operand.vmem [shape: f32[96,32], index: 3, kind: input, shape index: {}]   ;;  %s3974_s4 = inlined_call_operand.vmem [shape: f32[64,32], index: 4, kind: input, shape index: {}]   ;;  %s3975_s5 = inlined_call_operand.vmem [shape: f32[32,32], index: 5, kind: input, shape index: {}]   ;;  %s3976_s6 = inlined_call_operand.vmem [shape: f32[96,1], index: 6, kind: input, shape index: {}]   ;;  %s3977_s7 = inlined_call_operand.<no memory space> [shape: f32[1,1], index: 7, kind: input, shape index: {}]   ;;  %s3978_s8 = inlined_call_operand.hbm [shape: f32[2,3,32,128], index: 8, kind: output, shape index: {}]  }
   0x1   :  { %13 = sst [smem:[#allocation2]] %s3977_s7 }
   0x2   :  { %14 = vsyncpa [#allocation4], 0 }
   0x3   :  { %16 = vsyncpa [#allocation4 + $0x1], 0  ;;  %s3114_s29 = smov 0   ;;  %s3116_s30 = smov 0  }
   0x4   :  { %s3118_s9 = smov 0   ;;  %s3120_s10 = smov 0  }
   0x5   :  { %s3122_s11 = smov 0   ;;  %s3124_s12 = smov 0  }
   0x6 LB: > { %s2259_s7 = sadd.s32 4294967295, %s3057_s12   ;;  %s2260_s13 = sadd.s32 4294967294, %s3057_s12   ;;  %s3057_s12 = sphi %s3124_s12, %s22_s12   ;;  %s3053_s11 = sphi %s3122_s11, %s3989_s11   ;;  %s3049_s10 = sphi %s3120_s10, %s3988_s10   ;;  %s3045_s9 = sphi %s3118_s9, %s3987_s9   ;;  %s3041_s30 = sphi %s3116_s30, %s3986_s30   ;;  %s3037_s29 = sphi %s3114_s29, %s3985_s29  }
   0x7   : > { %s31_s14 = sadd.s32 1, %s3053_s11  ;;  %s218_s15 = sadd.s32 1, %s3045_s9 }
   0x8   : > { %p32_p0 = scmp.ge.s32.totalorder %s31_s14, 2  ;;  %p228_p1 = scmp.ne.s32.totalorder %s3045_s9, %s3041_s30 }
   0x9   : > { %p229_p2 = scmp.eq.s32.totalorder %s2259_s7, 1  ;;  %p234_p3 = scmp.ne.s32.totalorder %s3041_s30, %s3037_s29 }
   0xa   : > { %s3991_s14 = smov (%p32_p0, %s31_s14), 0  ;;  %p235_p5 = scmp.eq.s32.totalorder %s2260_s13, 1 }
   0xb   : > { %p3154_p4 = por %p229_p2, %p228_p1  ;;  %s213_s17 = ssub.s32 %s3053_s11, %s3991_s14 }
   0xc   : > { %p2263_p6 = scmp.ge.s32.totalorder %s3057_s12, 1  ;;  %p216_p7 = scmp.eq.s32.totalorder %s213_s17, 0 }
   0xd   : > { %p3161_p8 = por %p235_p5, %p234_p3  ;;  %p285_p9 = scmp.lt.s32.totalorder %s3057_s12, 3 }
   0xe   : > { %s3167_s19 = scalar_select %p216_p7, %s3045_s9, %s218_s15  }
   0xf   : > { %p286_p10 = pnand %p2263_p6, %p285_p9 }
  0x11   : > { %289 = sbr.rel (%p286_p10) target bundleno = 1287 (0x507), region = 52 }
  0x16   : > { %p322_p11 = scmp.lt.s32.totalorder %s3049_s10, 1  ;;  %v3059_v0 = vmov 0.0   ;;  %v370_v1 = vld [vmem:[%s3972_s2 + $0x10] sm:$0xff]  ;;  %vm3060_vm0 = vmmov 0   ;;  %v371_v2 = vld [vmem:[%s3972_s2 + $0x18] sm:$0xff]  ;;  %v3061_v3 = vmov 0  }
  0x17   : > { %2528 = vmatprep.subr.mxu0 %v3059_v0  ;;  %2539 = vmatprep.subr.mxu1 %v3059_v0  ;;  %v331_v12 = vld [vmem:[%s3971_s1] sm:$0x3]  ;;  %vm376_vm1 = vcmask 261120   ;;  %v3062_v15 = vmov 1   ;;  %v369_v18 = vld [vmem:[%s3972_s2 + $0x8] sm:$0xff]  ;;  %v363_v20 = vld [vmem:[%s3976_s6 + $0x38] sm:$0xff] }
  0x18   : > { %s323_s22 = scalar_select %p322_p11, %s3049_s10, 1  ;;  %2536 = vmatprep.mubr.msk.f32.mxu0 %vm3060_vm0, %v3059_v0  ;;  %2547 = vmatprep.mubr.msk.f32.mxu1 %vm3060_vm0, %v3059_v0  ;;  %v368_v19 = vld [vmem:[%s3972_s2] sm:$0xff]  ;;  %v361_v21 = vld [vmem:[%s3976_s6 + $0x28] sm:$0xff]  ;;  %v359_v24 = vld [vmem:[%s3976_s6 + $0x18] sm:$0xff] }
  0x19   : > { %2815 = vset.pattern.permute.xlu1 %v3061_v3  ;;  %2813 = vset.pattern.permute.xlu0 %v3061_v3  ;;  %v360_v22 = vld [vmem:[%s3976_s6 + $0x20] sm:$0xff]  ;;  %v357_v23 = vld [vmem:[%s3976_s6 + $0x8] sm:$0xff]  ;;  %v367_v26 = vld [vmem:[%s3976_s6 + $0x58] sm:$0xff]  ;;  %s319_s23 = sand.u32 1, %s3041_s30   ;;  %s2751_s27 = smul.u32 1536, %s3049_s10 }
  0x1a   : > { %s2750_s25 = smul.u32 96, %s323_s22  ;;  %626 = vperm.xlu1 %2815, %v370_v1   ;;  %631 = vperm.xlu0 %2813, %v371_v2   ;;  %v365_v25 = vld [vmem:[%s3976_s6 + $0x48] sm:$0xff]  ;;  %v3281_v27 = vld [vmem:[%s3973_s3] sm:$0xff]  ;;  %v3302_v30 = vld [vmem:[%s3974_s4 + $0x10] sm:$0xff]  ;;  %s330_s22 = sld [smem:[#allocation2]] }
  0x1b   : > { %v3286_v28 = vld [vmem:[%s3974_s4] sm:$0xff]  ;;  %v3295_v29 = vld [vmem:[%s3974_s4 + $0x8] sm:$0xff]  ;;  %v3309_v31 = vld [vmem:[%s3974_s4 + $0x18] sm:$0xff]  ;;  %s3740_s24 = smul.u32 96, %s319_s23  ;;  %s3920_s17 = scalar_lea.hbm %s3978_s8, %s2751_s27 }
  0x1c   : > { %s3184_s28 = scalar_lea.vmem %s3970_s0, %s2750_s25  ;;  %v3316_v32 = vld [vmem:[%s3974_s4 + $0x20] sm:$0xff]  ;;  %v3323_v33 = vld [vmem:[%s3974_s4 + $0x28] sm:$0xff]  ;;  %v3330_v34 = vld [vmem:[%s3974_s4 + $0x30] sm:$0xff]  ;;  %s3925_s10 = scalar_lea.sflag [#allocation4], %s319_s23 }
  0x1d   : > { %v3187_v4 = vld [vmem:[%s3184_s28 + $0x18] sm:$0xff]  ;;  %v3193_v6 = vld [vmem:[%s3184_s28 + $0x10] sm:$0xff]  ;;  %v3201_v8 = vld [vmem:[%s3184_s28 + $0x8] sm:$0xff]  ;;  %s3755_s25 = scalar_lea.vmem [#allocation3], %s3740_s24  ;;  %s3063_s20 = smov [#allocation3]  }
  0x1e   : > { %v3190_v5 = vld [vmem:[%s3184_s28 + $0x38] sm:$0xff]  ;;  %2529 = vmatpush3.msra.mxu0 %v3187_v4  ;;  %v3198_v7 = vld [vmem:[%s3184_s28 + $0x30] sm:$0xff]  ;;  %v3204_v9 = vld [vmem:[%s3184_s28 + $0x28] sm:$0xff]  ;;  %2816 = vset.pattern.permute.xlu1 %v3062_v15  ;;  %s2181_s7 = sshll.u32 %s3755_s25, 4  ;;  %s2985_s21 = sshll.u32 %s3063_s20, 4  ;;  %s3913_s7 = int_to_ptr.vmem [resolvable:$true] %s2181_s7  ;;  %s2986_s21 = int_to_ptr.vmem [resolvable:$false] %s2985_s21 }
  0x1f   : > { %2540 = vmatpush3.msra.mxu1 %v3190_v5  ;;  %2530 = vmatprep.subr.mxu0 %v3059_v0  ;;  %v3209_v10 = vld [vmem:[%s3184_s28] sm:$0xff]  ;;  %v3222_v13 = vld [vmem:[%s3184_s28 + $0x58] sm:$0xff]  ;;  %v3227_v14 = vld [vmem:[%s3184_s28 + $0x50] sm:$0xff]  ;;  %p2988_p1 = scmp.lt.s32.totalorder %s3913_s7, %s2986_s21 }
  0x20   : > { %2541 = vmatprep.subr.mxu1 %v3059_v0  ;;  %2531 = vmatpush3.msra.mxu0 %v3193_v6  ;;  %v3212_v11 = vld [vmem:[%s3184_s28 + $0x20] sm:$0xff]  ;;  %v3232_v16 = vld [vmem:[%s3184_s28 + $0x48] sm:$0xff]  ;;  %v3337_v35 = vld [vmem:[%s3974_s4 + $0x38] sm:$0xff] }
  0x21   : > { %2542 = vmatpush3.msra.mxu1 %v3198_v7  ;;  %2532 = vmatprep.subr.mxu0 %v3059_v0  ;;  %v3236_v17 = vld [vmem:[%s3184_s28 + $0x40] sm:$0xff]  ;;  %v362_v38 = vld [vmem:[%s3976_s6 + $0x30] sm:$0xff] }
  0x22   : > { %2543 = vmatprep.subr.mxu1 %v3059_v0  ;;  %2533 = vmatpush3.msra.mxu0 %v3201_v8  ;;  %v356_v44 = vld [vmem:[%s3976_s6] sm:$0xff]  ;;  %v358_v46 = vld [vmem:[%s3976_s6 + $0x10] sm:$0xff] }
  0x23   : > { %2544 = vmatpush3.msra.mxu1 %v3204_v9  ;;  %2534 = vmatprep.subr.mxu0 %v3059_v0  ;;  %v364_v52 = vld [vmem:[%s3976_s6 + $0x40] sm:$0xff]  ;;  %v366_v58 = vld [vmem:[%s3976_s6 + $0x50] sm:$0xff] }
  0x24   : > { %2545 = vmatprep.subr.mxu1 %v3059_v0  ;;  %2535 = vmatpush3.msra.mxu0 %v3209_v10 }
  0x25   : > { %2546 = vmatpush3.msra.mxu1 %v3212_v11  ;;  %2537 = vmatmul.mubr.msk.f32.vlgmr.msra.gmra.mxu0 %vm376_vm1, %v331_v12 }
  0x26   : > { %2548 = vmatmul.mubr.msk.f32.vlgmr.msra.gmra.mxu1 %vm376_vm1, %v331_v12  ;;  %2550 = vmatprep.subr.mxu0 %v3059_v0 }
  0x27   : > { %2558 = vmatprep.mubr.msk.f32.mxu0 %vm3060_vm0, %v3059_v0  ;;  %2551 = vmatpush3.msra.mxu0 %v3222_v13 }
  0x28   : > { %2552 = vmatprep.subr.mxu0 %v3059_v0  ;;  %651 = vperm.xlu1 %2816, %v370_v1  }
  0x29   : > { %2553 = vmatpush3.msra.mxu0 %v3227_v14  ;;  %2814 = vset.pattern.permute.xlu0 %v3062_v15  ;;  %v634_v15 = vlaneseq }
  0x2a   : > { %2554 = vmatprep.subr.mxu0 %v3059_v0  ;;  %655 = vperm.xlu0 %2814, %v371_v2  }
  0x2b   : > { %2555 = vmatpush3.msra.mxu0 %v3232_v16  ;;  %2569 = vmatprep.mubr.msk.f32.mxu1 %vm376_vm1, %v3281_v27 }
  0x2c   : > { %2556 = vmatprep.subr.mxu0 %v3059_v0  ;;  %2817 = vset.pattern.permute.xlu1 %v3061_v3 }
  0x2d   : > { %2557 = vmatpush3.msra.mxu0 %v3236_v17  ;;  %621 = vperm.xlu1 %2817, %v369_v18  }
  0x2e   : > { %2559 = vmatmul.mubr.msk.f32.vlgmr.msra.gmra.mxu0 %vm376_vm1, %v331_v12  ;;  %647 = vperm.xlu0 %2814, %v369_v18  }
  0x2f   : > { %2587 = vmatprep.subr.mxu0 %v3187_v4  ;;  %2595 = vmatprep.mubr.msk.f32.mxu0 %vm376_vm1, %v3286_v28 }
  0x30   : > { %2588 = vmatpush3.msra.mxu0 %v3187_v4 }
  0x31   : > { %616 = vperm.xlu1 %2817, %v368_v19   ;;  %2589 = vmatprep.subr.mxu0 %v3193_v6 }
  0x32   : > { %643 = vperm.xlu0 %2814, %v368_v19   ;;  %2590 = vmatpush3.msra.mxu0 %v3193_v6 }
  0x33   : > { %2591 = vmatprep.subr.mxu0 %v3201_v8 }
  0x34   : > { %2592 = vmatpush3.msra.mxu0 %v3201_v8 }
  0x35   : > { %719 = vperm.xlu1 %2817, %v363_v20   ;;  %2593 = vmatprep.subr.mxu0 %v3209_v10 }
  0x36   : > { %2594 = vmatpush3.msra.mxu0 %v3209_v10  ;;  %2818 = vset.pattern.permute.xlu0 %v3061_v3 }
  0x37   : > { %2596 = vmatmul.mubr.msk.f32.vlgmr.msra.gmra.mxu0 %vm376_vm1, %v3295_v29  ;;  %714 = vperm.xlu0 %2818, %v362_v38  }
  0x38   : > { %2598 = vmatprep.mubr.msk.f32.mxu0 %vm376_vm1, %v3302_v30 }
  0x39   : > { %709 = vperm.xlu1 %2817, %v361_v21  }
  0x3b   : > { %2599 = vmatmul.mubr.msk.f32.gmra.mxu0 %vm376_vm1, %v3309_v31  ;;  %684 = vperm.xlu0 %2818, %v356_v44  }
  0x3c   : > { %2601 = vmatprep.mubr.msk.f32.mxu0 %vm376_vm1, %v3316_v32 }
  0x3d   : > { %704 = vperm.xlu1 %2817, %v360_v22   ;;  %v635_v22 = vshrl.u32 %v634_v15, 7 }
  0x3f   : > { %2602 = vmatmul.mubr.msk.f32.gmra.mxu0 %vm376_vm1, %v3323_v33  ;;  %694 = vperm.xlu0 %2818, %v358_v46  }
  0x40   : > { %2604 = vmatprep.mubr.msk.f32.mxu0 %vm376_vm1, %v3330_v34 }
  0x41   : > { %689 = vperm.xlu1 %2817, %v357_v23  }
  0x43   : > { %2605 = vmatmul.mubr.msk.f32.gmra.mxu0 %vm376_vm1, %v3337_v35  ;;  %724 = vperm.xlu0 %2818, %v364_v52  }
  0x45   : > { %699 = vperm.xlu1 %2817, %v359_v24  }
  0x47   : > { %734 = vperm.xlu0 %2818, %v366_v58  }
  0x49   : > { %729 = vperm.xlu1 %2817, %v365_v25   ;;  %v636_v25 = vsub.s32 0, %v635_v22 }
  0x4d   : > { %739 = vperm.xlu1 %2817, %v367_v26  }
  0x95   : > { %v3356_v18 = vpop.permute.xlu1 %626  ;;  %v632_v20 = vpop.permute.xlu0 %631 }
  0xa3   : > { %v3358_v23 = vpop.permute.xlu1 %651 }
  0xa5   : > { %v656_v24 = vpop.permute.xlu0 %655 }
  0xe5   : > { %v446_v36 = vpop.f32.mrf.mxu0 }
  0xe6   : > { %v521_v37 = vpop.f32.mrf.mxu1 }
  0xe7   : > { %v600_v39 = vsub.f32 %v446_v36, %v521_v37  ;;  %v1230_v40 = vsub.f32 %v521_v37, %v446_v36  ;;  %v2538_v41 = vpop.f32.mrf.mxu0 }
  0xe8   : > { %v2549_v42 = vpop.f32.mrf.mxu1 }
  0xe9   : > { %v2276_v43 = vmul.f32 -1.442695, %v600_v39  ;;  %v2314_v45 = vmul.f32 -1.442695, %v1230_v40  ;;  %v3360_v42 = vpop.permute.xlu1 %621 }
  0xeb   : > { %2819 = vpow2.f32 %v2276_v43  ;;  %v3362_v43 = vpop.permute.xlu0 %647 }
  0xec   : > { %2821 = vpow2.f32 %v2314_v45 }
  0xee   : > { %v596_v47 = vpop.f32.mrf.mxu0 }
  0xef   : > { %v607_v48 = vsub.f32 %v446_v36, %v596_v47  ;;  %v1237_v49 = vsub.f32 %v521_v37, %v596_v47  ;;  %v1700_v50 = vsub.f32 %v596_v47, %v446_v36  ;;  %v1707_v51 = vsub.f32 %v596_v47, %v521_v37 }
  0xf0   : > { %v2560_v53 = vpop.f32.mrf.mxu0  ;;  %v660_v36 = vsub.s32 1, %v635_v22 }
  0xf1   : > { %v2277_v54 = vmul.f32 -1.442695, %v607_v48  ;;  %v2315_v55 = vmul.f32 -1.442695, %v1237_v49  ;;  %v2360_v56 = vmul.f32 -1.442695, %v1700_v50 }
  0xf2   : > { %v2361_v57 = vmul.f32 -1.442695, %v1707_v51 }
  0xf3   : > { %2823 = vpow2.f32 %v2277_v54 }
  0xf4   : > { %2825 = vpow2.f32 %v2315_v55 }
  0xf5   : > { %2827 = vpow2.f32 %v2360_v56  ;;  %v3368_v56 = vpop.permute.xlu1 %616 }
  0xf6   : > { %2829 = vpow2.f32 %v2361_v57 }
  0xf8   : > { %v2820_v59 = vpop.eup %2819 }
  0xf9   : > { %v2822_v60 = vpop.eup %2821  ;;  %v604_v61 = vadd.f32 1.0, %v2820_v59  ;;  %v3370_v59 = vpop.permute.xlu0 %643 }
  0xfa   : > { %v1234_v62 = vadd.f32 1.0, %v2822_v60 }
  0xfb   : > { %2831 = vrcp.f32 %v604_v61 }
  0xfc   : > { %2833 = vrcp.f32 %v1234_v62 }
 0x100   : > { %v2824_v63 = vpop.eup %2823 }
 0x101   : > { %v2826_v0 = vpop.eup %2825  ;;  %v611_v1 = vadd.f32 1.0, %v2824_v63 }
 0x102   : > { %v2828_v2 = vpop.eup %2827  ;;  %v1241_v3 = vadd.f32 1.0, %v2826_v0 }
 0x103   : > { %v2830_v12 = vpop.eup %2829  ;;  %2835 = vrcp.f32 %v611_v1  ;;  %v1704_v19 = vadd.f32 1.0, %v2828_v2 }
 0x104   : > { %2837 = vrcp.f32 %v1241_v3  ;;  %v1711_v21 = vadd.f32 1.0, %v2830_v12 }
 0x105   : > { %2839 = vrcp.f32 %v1704_v19 }
 0x106   : > { %2841 = vrcp.f32 %v1711_v21 }
 0x108   : > { %v2832_v26 = vpop.eup %2831 }
 0x109   : > { %v2834_v37 = vpop.eup %2833  ;;  %v637_v39 = vrot.slane %v2832_v26, %v636_v25 }
 0x10a   : > { %v1247_v49 = vrot.slane %v2834_v37, %v636_v25 }
 0x10b   : > { %v640_v48 = vmul.f32 %v637_v39, %v3356_v18  ;;  %v641_v50 = vmul.f32 %v637_v39, %v632_v20  ;;  %v639_v51 = vmul.f32 %v637_v39, %v3360_v42  ;;  %v638_v62 = vmul.f32 %v637_v39, %v3368_v56 }
 0x10c   : > { %v1250_v60 = vmul.f32 %v1247_v49, %v3356_v18  ;;  %v1251_v1 = vmul.f32 %v1247_v49, %v632_v20  ;;  %v1249_v39 = vmul.f32 %v1247_v49, %v3360_v42 }
 0x110   : > { %v2836_v38 = vpop.eup %2835 }
 0x111   : > { %v2838_v40 = vpop.eup %2837  ;;  %v661_v41 = vrot.slane %v2836_v38, %v660_v36 }
 0x112   : > { %v1255_v45 = vrot.slane %v2838_v40, %v660_v36  ;;  %v2840_v52 = vpop.eup %2839 }
 0x113   : > { %v664_v44 = vmul.f32 %v661_v41, %v3358_v23  ;;  %v665_v46 = vmul.f32 %v661_v41, %v656_v24  ;;  %v663_v47 = vmul.f32 %v661_v41, %v3362_v43  ;;  %v2842_v55 = vpop.eup %2841  ;;  %v662_v63 = vmul.f32 %v661_v41, %v3370_v59 }
 0x114   : > { %v1259_v57 = vmul.f32 %v1255_v45, %v656_v24  ;;  %v1258_v61 = vmul.f32 %v1255_v45, %v3358_v23  ;;  %v3376_v0 = vrot.slane %v2840_v52, %v636_v25  ;;  %v3380_v12 = vrot.slane %v2842_v55, %v660_v36 }
 0x115   : > { %v668_v53 = vadd.f32 %v664_v44, %v640_v48  ;;  %v669_v54 = vadd.f32 %v665_v46, %v641_v50  ;;  %v667_v58 = vadd.f32 %v663_v47, %v639_v51  ;;  %v1257_v15 = vmul.f32 %v1255_v45, %v3362_v43 }
 0x116   : > { %v666_v19 = vadd.f32 %v662_v63, %v638_v62  ;;  %v1263_v22 = vadd.f32 %v1259_v57, %v1251_v1  ;;  %v1262_v25 = vadd.f32 %v1258_v61, %v1250_v60  ;;  %v1256_v41 = vmul.f32 %v1255_v45, %v3370_v59  ;;  %v3406_v60 = vld [vmem:[%s3973_s3 + $0x10] sm:$0xff] }
 0x117   : > { %v673_v2 = vmul.f32 %v3190_v5, %v669_v54  ;;  %v677_v3 = vmul.f32 %v3222_v13, %v669_v54  ;;  %v672_v21 = vmul.f32 %v3198_v7, %v668_v53  ;;  %v676_v37 = vmul.f32 %v3227_v14, %v668_v53 }
 0x118   : > { %v671_v38 = vmul.f32 %v3204_v9, %v667_v58  ;;  %v675_v40 = vmul.f32 %v3232_v16, %v667_v58  ;;  %v670_v44 = vmul.f32 %v3212_v11, %v666_v19  ;;  %v674_v46 = vmul.f32 %v3236_v17, %v666_v19  ;;  %v3424_v19 = vld [vmem:[%s3973_s3 + $0x20] sm:$0xff] }
 0x119   : > { %v681_v26 = vadd.f32 %v677_v3, %v673_v2  ;;  %v680_v36 = vadd.f32 %v676_v37, %v672_v21  ;;  %v1248_v47 = vmul.f32 %v1247_v49, %v3368_v56  ;;  %v1721_v48 = vmul.f32 %v3376_v0, %v632_v20  ;;  %v3401_v20 = vld [vmem:[%s3973_s3 + $0x8] sm:$0xff]  ;;  %v3419_v3 = vld [vmem:[%s3973_s3 + $0x18] sm:$0xff] }
 0x11a   : > { %v1729_v50 = vmul.f32 %v3380_v12, %v656_v24  ;;  %v1261_v51 = vadd.f32 %v1257_v15, %v1249_v39  ;;  %v679_v52 = vadd.f32 %v675_v40, %v671_v38  ;;  %v1271_v53 = vmul.f32 %v1263_v22, %v3187_v4  ;;  %v3435_v37 = vld [vmem:[%s3973_s3 + $0x28] sm:$0xff]  ;;  %v339_v39 = vld [vmem:[%s3973_s3 + $0x38] sm:$0xff]  ;;  %v340_v40 = vld [vmem:[%s3973_s3 + $0x40] sm:$0xff] }
 0x11b   : > { %2561 = vmatprep.subr.mxu1 %v681_v26  ;;  %v1279_v45 = vmul.f32 %v3222_v13, %v1263_v22  ;;  %v1260_v54 = vadd.f32 %v1256_v41, %v1248_v47  ;;  %v678_v55 = vadd.f32 %v674_v46, %v670_v44  ;;  %v1270_v57 = vmul.f32 %v1262_v25, %v3193_v6  ;;  %v341_v44 = vld [vmem:[%s3973_s3 + $0x48] sm:$0xff] }
 0x11c   : > { %2562 = vmatpush3.msra.mxu1 %v681_v26  ;;  %v1278_v49 = vmul.f32 %v3227_v14, %v1262_v25  ;;  %v1733_v24 = vadd.f32 %v1729_v50, %v1721_v48  ;;  %v1269_v61 = vmul.f32 %v1261_v51, %v3201_v8  ;;  %v1277_v62 = vmul.f32 %v3232_v16, %v1261_v51  ;;  %v3440_v25 = vld [vmem:[%s3973_s3 + $0x30] sm:$0xff] }
 0x11d   : > { %2563 = vmatprep.subr.mxu1 %v680_v36  ;;  %v1283_v58 = vadd.f32 %v1279_v45, %v1271_v53  ;;  %v1268_v1 = vmul.f32 %v1260_v54, %v3209_v10  ;;  %v1276_v2 = vmul.f32 %v3236_v17, %v1260_v54  ;;  %v1720_v41 = vmul.f32 %v3376_v0, %v3356_v18  ;;  %v342_v18 = vld [vmem:[%s3973_s3 + $0x50] sm:$0xff] }
 0x11e   : > { %2564 = vmatpush3.msra.mxu1 %v680_v36  ;;  %v1282_v63 = vadd.f32 %v1278_v49, %v1270_v57  ;;  %v1281_v15 = vadd.f32 %v1277_v62, %v1269_v61  ;;  %v1741_v21 = vmul.f32 %v1733_v24, %v3187_v4  ;;  %v1749_v22 = vmul.f32 %v3190_v5, %v1733_v24 }
 0x11f   : > { %2565 = vmatprep.subr.mxu1 %v679_v52  ;;  %v1280_v26 = vadd.f32 %v1276_v2, %v1268_v1  ;;  %v1728_v36 = vmul.f32 %v3380_v12, %v3358_v23  ;;  %v1719_v46 = vmul.f32 %v3376_v0, %v3360_v42  ;;  %v1727_v47 = vmul.f32 %v3380_v12, %v3362_v43  ;;  %v343_v42 = vld [vmem:[%s3973_s3 + $0x58] sm:$0xff] }
 0x120   : > { %2566 = vmatpush3.msra.mxu1 %v679_v52  ;;  %v1753_v38 = vadd.f32 %v1749_v22, %v1741_v21  ;;  %v1718_v23 = vmul.f32 %v3376_v0, %v3368_v56  ;;  %v1726_v50 = vmul.f32 %v3380_v12, %v3370_v59 }
 0x121   : > { %2567 = vmatprep.subr.mxu1 %v678_v55  ;;  %v1732_v48 = vadd.f32 %v1728_v36, %v1720_v41  ;;  %v1731_v43 = vadd.f32 %v1727_v47, %v1719_v46 }
 0x122   : > { %2568 = vmatpush3.msra.mxu1 %v678_v55  ;;  %v1730_v51 = vadd.f32 %v1726_v50, %v1718_v23 }
 0x123   : > { %2570 = vmatmul.mubr.msk.f32.vlgmr.msra.gmra.mxu1 %vm376_vm1, %v3401_v20  ;;  %2621 = vmatprep.subr.mxu1 %v1283_v58  ;;  %v1740_v52 = vmul.f32 %v1732_v48, %v3193_v6  ;;  %v1748_v53 = vmul.f32 %v3198_v7, %v1732_v48  ;;  %v1739_v56 = vmul.f32 %v1731_v43, %v3201_v8 }
 0x124   : > { %2622 = vmatpush3.msra.mxu1 %v1283_v58  ;;  %2572 = vmatprep.mubr.msk.f32.mxu1 %vm376_vm1, %v3406_v60  ;;  %v1747_v59 = vmul.f32 %v3204_v9, %v1731_v43  ;;  %v1738_v12 = vmul.f32 %v1730_v51, %v3209_v10  ;;  %v1746_v45 = vmul.f32 %v3212_v11, %v1730_v51 }
 0x125   : > { %2623 = vmatprep.subr.mxu1 %v1282_v63  ;;  %v1752_v0 = vadd.f32 %v1748_v53, %v1740_v52 }
 0x126   : > { %2624 = vmatpush3.msra.mxu1 %v1282_v63  ;;  %v1751_v54 = vadd.f32 %v1747_v59, %v1739_v56  ;;  %v1750_v55 = vadd.f32 %v1746_v45, %v1738_v12 }
 0x127   : > { %2573 = vmatmul.mubr.msk.f32.gmra.mxu1 %vm376_vm1, %v3419_v3  ;;  %2625 = vmatprep.subr.mxu1 %v1281_v15 }
 0x128   : > { %2626 = vmatpush3.msra.mxu1 %v1281_v15  ;;  %2575 = vmatprep.mubr.msk.f32.mxu1 %vm376_vm1, %v3424_v19 }
 0x129   : > { %2627 = vmatprep.subr.mxu1 %v1280_v26 }
 0x12a   : > { %2628 = vmatpush3.msra.mxu1 %v1280_v26 }
 0x12b   : > { %2576 = vmatmul.mubr.msk.f32.gmra.mxu1 %vm376_vm1, %v3435_v37  ;;  %2681 = vmatprep.subr.mxu1 %v1753_v38 }
 0x12c   : > { %2578 = vmatprep.mubr.msk.f32.mxu1 %vm376_vm1, %v3440_v25 }
 0x12f   : > { %2579 = vmatmul.mubr.msk.f32.gmra.mxu1 %vm376_vm1, %v339_v39 }
 0x130   : > { %2581 = vmatprep.mubr.msk.f32.mxu1 %vm376_vm1, %v340_v40 }
 0x133   : > { %2582 = vmatmul.mubr.msk.f32.gmra.mxu1 %vm376_vm1, %v341_v44 }
 0x134   : > { %2584 = vmatprep.mubr.msk.f32.mxu1 %vm376_vm1, %v342_v18 }
 0x137   : > { %2585 = vmatmul.mubr.msk.f32.gmra.mxu1 %vm376_vm1, %v343_v42 }
 0x138   : > { %2629 = vmatprep.mubr.msk.f32.mxu1 %vm376_vm1, %v3281_v27 }
 0x13b   : > { %2630 = vmatmul.mubr.msk.f32.vlgmr.msra.gmra.mxu1 %vm376_vm1, %v3401_v20 }
 0x13c   : > { %2682 = vmatpush3.msra.mxu1 %v1753_v38  ;;  %2632 = vmatprep.mubr.msk.f32.mxu1 %vm376_vm1, %v3406_v60 }
 0x13d   : > { %2683 = vmatprep.subr.mxu1 %v1752_v0 }
 0x13e   : > { %2684 = vmatpush3.msra.mxu1 %v1752_v0 }
 0x13f   : > { %2685 = vmatprep.subr.mxu1 %v1751_v54  ;;  %2633 = vmatmul.mubr.msk.f32.gmra.mxu1 %vm376_vm1, %v3419_v3 }
 0x140   : > { %2686 = vmatpush3.msra.mxu1 %v1751_v54  ;;  %2635 = vmatprep.mubr.msk.f32.mxu1 %vm376_vm1, %v3424_v19 }
 0x141   : > { %2687 = vmatprep.subr.mxu1 %v1750_v55 }
 0x142   : > { %2688 = vmatpush3.msra.mxu1 %v1750_v55 }
 0x143   : > { %2636 = vmatmul.mubr.msk.f32.gmra.mxu1 %vm376_vm1, %v3435_v37  ;;  %2741 = vmatprep.subr.mxu1 %v3222_v13 }
 0x144   : > { %2638 = vmatprep.mubr.msk.f32.mxu1 %vm376_vm1, %v3440_v25 }
 0x147   : > { %2639 = vmatmul.mubr.msk.f32.gmra.mxu1 %vm376_vm1, %v339_v39 }
 0x148   : > { %2641 = vmatprep.mubr.msk.f32.mxu1 %vm376_vm1, %v340_v40 }
 0x14b   : > { %2642 = vmatmul.mubr.msk.f32.gmra.mxu1 %vm376_vm1, %v341_v44 }
 0x14c   : > { %2644 = vmatprep.mubr.msk.f32.mxu1 %vm376_vm1, %v342_v18 }
 0x14f   : > { %2645 = vmatmul.mubr.msk.f32.gmra.mxu1 %vm376_vm1, %v343_v42 }
 0x150   : > { %2689 = vmatprep.mubr.msk.f32.mxu1 %vm376_vm1, %v3281_v27  ;;  %v3547_v27 = vpop.permute.xlu1 %719 }
 0x153   : > { %2690 = vmatmul.mubr.msk.f32.vlgmr.msra.gmra.mxu1 %vm376_vm1, %v3401_v20 }
 0x154   : > { %2692 = vmatprep.mubr.msk.f32.mxu1 %vm376_vm1, %v3406_v60  ;;  %2745 = vmatpush3.msra.mxu1 %v3222_v13  ;;  %v3537_v13 = vld [vmem:[%s3975_s5] sm:$0xff]  ;;  %v3555_v24 = vpop.permute.xlu1 %709 }
 0x155   : > { %2742 = vmatprep.subr.mxu1 %v3227_v14  ;;  %2615 = vmatprep.mubr.msk.f32.mxu0 %vm376_vm1, %v3537_v13 }
 0x156   : > { %2746 = vmatpush3.msra.mxu1 %v3227_v14  ;;  %v3541_v14 = vpop.f32.mrf.mxu0 }
 0x157   : > { %2693 = vmatmul.mubr.msk.f32.gmra.mxu1 %vm376_vm1, %v3419_v3  ;;  %2743 = vmatprep.subr.mxu1 %v3232_v16 }
 0x158   : > { %2695 = vmatprep.mubr.msk.f32.mxu1 %vm376_vm1, %v3424_v19  ;;  %2747 = vmatpush3.msra.mxu1 %v3232_v16  ;;  %v3543_v16 = vpop.f32.mrf.mxu0  ;;  %v3562_v2 = vpop.permute.xlu1 %704 }
 0x159   : > { %2744 = vmatprep.subr.mxu1 %v3236_v17 }
 0x15a   : > { %2748 = vmatpush3.msra.mxu1 %v3236_v17  ;;  %v3545_v17 = vpop.f32.mrf.mxu0 }
 0x15b   : > { %2696 = vmatmul.mubr.msk.f32.gmra.mxu1 %vm376_vm1, %v3435_v37 }
 0x15c   : > { %2698 = vmatprep.mubr.msk.f32.mxu1 %vm376_vm1, %v3440_v25  ;;  %v3551_v49 = vpop.f32.mrf.mxu0  ;;  %v3566_v25 = vpop.permute.xlu0 %714 }
 0x15d   : > { %v3579_v51 = vpop.permute.xlu1 %689 }
 0x15e   : > { %v2603_v60 = vpop.f32.mrf.mxu0 }
 0x15f   : > { %2699 = vmatmul.mubr.msk.f32.gmra.mxu1 %vm376_vm1, %v339_v39 }
 0x160   : > { %2701 = vmatprep.mubr.msk.f32.mxu1 %vm376_vm1, %v340_v40  ;;  %v1013_v63 = vpop.f32.mrf.mxu0  ;;  %v3583_v53 = vpop.permute.xlu0 %684 }
 0x161   : > { %v3589_v54 = vpop.permute.xlu1 %699 }
 0x162   : > { %v2606_v22 = vpop.f32.mrf.mxu0 }
 0x163   : > { %2702 = vmatmul.mubr.msk.f32.gmra.mxu1 %vm376_vm1, %v341_v44 }
 0x164   : > { %2704 = vmatprep.mubr.msk.f32.mxu1 %vm376_vm1, %v342_v18  ;;  %v1023_v44 = vpop.f32.mrf.mxu0 }
 0x167   : > { %2705 = vmatmul.mubr.msk.f32.gmra.mxu1 %vm376_vm1, %v343_v42 }
 0x168   : > { %2724 = vmatprep.mubr.msk.f32.mxu1 %vm376_vm1, %v3330_v34 }
 0x16b   : > { %2725 = vmatmul.mubr.msk.f32.vlgmr.msra.gmra.mxu1 %vm376_vm1, %v3337_v35 }
 0x1e3   : > { %v3549_v57 = vpop.f32.mrf.mxu1 }
 0x1e5   : > { %v3553_v20 = vpop.f32.mrf.mxu1 }
 0x1e7   : > { %v3557_v58 = vpop.f32.mrf.mxu1 }
 0x1e9   : > { %v3559_v61 = vpop.f32.mrf.mxu1 }
 0x1eb   : > { %v2577_v62 = vpop.f32.mrf.mxu1 }
 0x1ec   : > { %v870_v1 = vadd.f32 %v2577_v62, %v3555_v24 }
 0x1ed   : > { %v864_v3 = vpop.f32.mrf.mxu1 }
 0x1ee   : > { %v1061_v15 = vadd.f32 %v2603_v60, %v870_v1  ;;  %v865_v19 = vadd.f32 %v864_v3, %v3562_v2  ;;  %v3593_v1 = vpop.permute.xlu0 %694 }
 0x1ef   : > { %v2580_v21 = vpop.f32.mrf.mxu1 }
 0x1f0   : > { %v2303_v26 = vmul.f32 -1.442695, %v1061_v15  ;;  %v1060_v37 = vadd.f32 %v1013_v63, %v865_v19  ;;  %v880_v38 = vadd.f32 %v2580_v21, %v3547_v27 }
 0x1f1   : > { %v874_v39 = vpop.f32.mrf.mxu1 }
 0x1f2   : > { %v2302_v40 = vmul.f32 -1.442695, %v1060_v37  ;;  %v1063_v41 = vadd.f32 %v2606_v22, %v880_v38  ;;  %v875_v36 = vadd.f32 %v874_v39, %v3566_v25  ;;  %2843 = vpow2.f32 %v2303_v26  ;;  %v3599_v22 = vpop.permute.xlu1 %729  ;;  %v3603_v37 = vpop.permute.xlu0 %724 }
 0x1f3   : > { %v3569_v46 = vpop.f32.mrf.mxu1 }
 0x1f4   : > { %v2305_v47 = vmul.f32 -1.442695, %v1063_v41  ;;  %v1062_v18 = vadd.f32 %v1023_v44, %v875_v36  ;;  %2845 = vpow2.f32 %v2302_v40 }
 0x1f5   : > { %v3571_v48 = vpop.f32.mrf.mxu1 }
 0x1f6   : > { %2847 = vpow2.f32 %v2305_v47  ;;  %v2304_v23 = vmul.f32 -1.442695, %v1062_v18  ;;  %v3609_v40 = vpop.permute.xlu1 %739  ;;  %v3614_v44 = vpop.permute.xlu0 %734 }
 0x1f7   : > { %v3573_v50 = vpop.f32.mrf.mxu1 }
 0x1f8   : > { %2849 = vpow2.f32 %v2304_v23 }
 0x1f9   : > { %v3575_v42 = vpop.f32.mrf.mxu1 }
 0x1fb   : > { %v3577_v43 = vpop.f32.mrf.mxu1 }
 0x1fd   : > { %v3581_v52 = vpop.f32.mrf.mxu1 }
 0x1ff   : > { %v3585_v56 = vpop.f32.mrf.mxu1  ;;  %v2844_v59 = vpop.eup %2843 }
 0x200   : > { %v1077_v55 = vadd.f32 1.0, %v2844_v59 }
 0x201   : > { %v3587_v0 = vpop.f32.mrf.mxu1  ;;  %v2846_v12 = vpop.eup %2845 }
 0x202   : > { %v1076_v15 = vadd.f32 1.0, %v2846_v12 }
 0x203   : > { %v2848_v45 = vpop.eup %2847  ;;  %v3591_v60 = vpop.f32.mrf.mxu1 }
 0x204   : > { %v1079_v62 = vadd.f32 1.0, %v2848_v45 }
 0x205   : > { %v2850_v63 = vpop.eup %2849  ;;  %v3595_v3 = vpop.f32.mrf.mxu1 }
 0x206   : > { %2851 = vrcp.f32 %v1079_v62  ;;  %v1078_v19 = vadd.f32 1.0, %v2850_v63 }
 0x207   : > { %2853 = vrcp.f32 %v1077_v55  ;;  %v3597_v21 = vpop.f32.mrf.mxu1 }
 0x208   : > { %2855 = vrcp.f32 %v1078_v19 }
 0x209   : > { %v3601_v26 = vpop.f32.mrf.mxu1  ;;  %2857 = vrcp.f32 %v1076_v15 }
 0x20b   : > { %v3605_v38 = vpop.f32.mrf.mxu1 }
 0x20d   : > { %v3607_v39 = vpop.f32.mrf.mxu1 }
 0x20f   : > { %v2646_v41 = vpop.f32.mrf.mxu1 }
 0x210   : > { %v3612_v36 = vadd.f32 %v2646_v41, %v3609_v40 }
 0x211   : > { %v1400_v47 = vpop.f32.mrf.mxu1 }
 0x212   : > { %v3617_v18 = vadd.f32 %v1400_v47, %v3614_v44 }
 0x213   : > { %v2852_v23 = vpop.eup %2851  ;;  %v3619_v59 = vpop.f32.mrf.mxu1 }
 0x214   : > { %3981 = vst [vmem:[#allocation6_spill] sm:$0xff] %v3617_v18  ;;  %v2854_v12 = vpop.eup %2853  ;;  %v1091_v45 = vmul.f32 %v2852_v23, %v3187_v4  ;;  %v3641_v23 = vld [vmem:[%s3975_s5 + $0x10] sm:$0xff] }
 0x215   : > { %v2856_v55 = vpop.eup %2855  ;;  %v3622_v62 = vpop.f32.mrf.mxu1  ;;  %v1089_v41 = vmul.f32 %v2854_v12, %v3201_v8 }
 0x216   : > { %2607 = vmatprep.subr.mxu0 %v1091_v45  ;;  %v1090_v63 = vmul.f32 %v2856_v55, %v3193_v6  ;;  %v2858_v15 = vpop.eup %2857  ;;  %v3636_v6 = vld [vmem:[%s3975_s5 + $0x8] sm:$0xff] }
 0x217   : > { %2608 = vmatpush3.msra.mxu0 %v1091_v45  ;;  %v3625_v19 = vpop.f32.mrf.mxu1  ;;  %v1088_v18 = vmul.f32 %v2858_v15, %v3209_v10  ;;  %v3656_v45 = vld [vmem:[%s3975_s5 + $0x18] sm:$0xff] }
 0x218   : > { %2609 = vmatprep.subr.mxu0 %v1090_v63 }
 0x219   : > { %2610 = vmatpush3.msra.mxu0 %v1090_v63  ;;  %v3628_v47 = vpop.f32.mrf.mxu1 }
 0x21a   : > { %2611 = vmatprep.subr.mxu0 %v1089_v41 }
 0x21b   : > { %2612 = vmatpush3.msra.mxu0 %v1089_v41  ;;  %v3631_v4 = vpop.f32.mrf.mxu1 }
 0x21c   : > { %2613 = vmatprep.subr.mxu0 %v1088_v18 }
 0x21d   : > { %2614 = vmatpush3.msra.mxu0 %v1088_v18  ;;  %v3643_v12 = vpop.f32.mrf.mxu1 }
 0x21e   : > { %2616 = vmatmul.mubr.msk.f32.vlgmr.msra.gmra.mxu0 %vm376_vm1, %v3636_v6  ;;  %2647 = vmatprep.subr.mxu0 %v3190_v5 }
 0x21f   : > { %2648 = vmatpush3.msra.mxu0 %v3190_v5  ;;  %v3649_v10 = vpop.f32.mrf.mxu1  ;;  %2618 = vmatprep.mubr.msk.f32.mxu0 %vm376_vm1, %v3641_v23 }
 0x220   : > { %2649 = vmatprep.subr.mxu0 %v3198_v7 }
 0x221   : > { %2650 = vmatpush3.msra.mxu0 %v3198_v7  ;;  %v3660_v18 = vpop.f32.mrf.mxu1 }
 0x222   : > { %2619 = vmatmul.mubr.msk.f32.gmra.mxu0 %vm376_vm1, %v3656_v45  ;;  %2651 = vmatprep.subr.mxu0 %v3204_v9 }
 0x223   : > { %2652 = vmatpush3.msra.mxu0 %v3204_v9  ;;  %v3666_v5 = vpop.f32.mrf.mxu1  ;;  %2655 = vmatprep.mubr.msk.f32.mxu0 %vm376_vm1, %v3286_v28  ;;  %v845_v28 = vadd.f32 %v3553_v20, %v3583_v53 }
 0x224   : > { %2653 = vmatprep.subr.mxu0 %v3212_v11 }
 0x225   : > { %2654 = vmatpush3.msra.mxu0 %v3212_v11  ;;  %v3672_v55 = vpop.f32.mrf.mxu1  ;;  %v850_v11 = vadd.f32 %v3549_v57, %v3579_v51 }
 0x226   : > { %2656 = vmatmul.mubr.msk.f32.vlgmr.msra.gmra.mxu0 %vm376_vm1, %v3295_v29 }
 0x227   : > { %v2706_v7 = vpop.f32.mrf.mxu1  ;;  %2658 = vmatprep.mubr.msk.f32.mxu0 %vm376_vm1, %v3302_v30  ;;  %v1033_v29 = vadd.f32 %v3541_v14, %v850_v11  ;;  %v860_v30 = vadd.f32 %v3557_v58, %v3589_v54 }
 0x228   : > { %v3679_v9 = vadd.f32 %v2706_v7, %v3609_v40 }
 0x229   : > { %v1870_v63 = vpop.f32.mrf.mxu1 }
 0x22a   : > { %v3682_v15 = vadd.f32 %v1870_v63, %v3614_v44  ;;  %2659 = vmatmul.mubr.msk.f32.gmra.mxu0 %vm376_vm1, %v3309_v31  ;;  %v855_v31 = vadd.f32 %v3559_v61, %v3593_v1 }
 0x22b   : > { %2661 = vmatprep.mubr.msk.f32.mxu0 %vm376_vm1, %v3316_v32  ;;  %v1032_v32 = vadd.f32 %v3543_v16, %v845_v28 }
 0x22c   : > { %3982 = vst [vmem:[#allocation7_spill] sm:$0xff] %v3682_v15 }
 0x22d   : > { %v2298_v41 = vmul.f32 -1.442695, %v1032_v32  ;;  %v900_v32 = vadd.f32 %v3573_v50, %v3609_v40 }
 0x22e   : > { %2662 = vmatmul.mubr.msk.f32.gmra.mxu0 %vm376_vm1, %v3323_v33  ;;  %v2299_v33 = vmul.f32 -1.442695, %v1033_v29  ;;  %v885_v29 = vadd.f32 %v3571_v48, %v3603_v37 }
 0x22f   : > { %2664 = vmatprep.mubr.msk.f32.mxu0 %vm376_vm1, %v3330_v34  ;;  %v1035_v34 = vadd.f32 %v3545_v17, %v860_v30  ;;  %v890_v17 = vadd.f32 %v3569_v46, %v3599_v22 }
 0x230   : > { %2859 = vpow2.f32 %v2299_v33 }
 0x231   : > { %v2301_v57 = vmul.f32 -1.442695, %v1035_v34  ;;  %2861 = vpow2.f32 %v2298_v41 }
 0x232   : > { %2665 = vmatmul.mubr.msk.f32.gmra.mxu0 %vm376_vm1, %v3337_v35  ;;  %v1034_v35 = vadd.f32 %v3551_v49, %v855_v31 }
 0x233   : > { %2675 = vmatprep.mubr.msk.f32.mxu0 %vm376_vm1, %v3537_v13  ;;  %2863 = vpow2.f32 %v2301_v57  ;;  %v1356_v57 = vadd.f32 %v3577_v43, %v3579_v51 }
 0x234   : > { %v2300_v7 = vmul.f32 -1.442695, %v1034_v35  ;;  %v895_v35 = vadd.f32 %v3575_v42, %v3614_v44  ;;  %v1366_v42 = vadd.f32 %v3585_v56, %v3589_v54 }
 0x236   : > { %2865 = vpow2.f32 %v2300_v7 }
 0x23d   : > { %v2860_v14 = vpop.eup %2859 }
 0x23e   : > { %v2862_v20 = vpop.eup %2861  ;;  %v1049_v58 = vadd.f32 1.0, %v2860_v14  ;;  %v1351_v14 = vadd.f32 %v3581_v52, %v3583_v53 }
 0x23f   : > { %v1048_v61 = vadd.f32 1.0, %v2862_v20 }
 0x240   : > { %v2864_v63 = vpop.eup %2863  ;;  %2867 = vrcp.f32 %v1049_v58 }
 0x241   : > { %v1051_v16 = vadd.f32 1.0, %v2864_v63  ;;  %2869 = vrcp.f32 %v1048_v61 }
 0x243   : > { %v2866_v11 = vpop.eup %2865  ;;  %2871 = vrcp.f32 %v1051_v16 }
 0x244   : > { %v1050_v28 = vadd.f32 1.0, %v2866_v11  ;;  %v1361_v11 = vadd.f32 %v3587_v0, %v3593_v1 }
 0x246   : > { %2873 = vrcp.f32 %v1050_v28 }
 0x24d   : > { %v2868_v40 = vpop.eup %2867 }
 0x24e   : > { %v2870_v58 = vpop.eup %2869  ;;  %v1198_v63 = vsub.f32 1.0, %v2868_v40 }
 0x250   : > { %v2872_v52 = vpop.eup %2871 }
 0x253   : > { %v2874_v28 = vpop.eup %2873 }
 0x2de   : > { %v2617_v49 = vpop.f32.mrf.mxu0 }
 0x2df   : > { %v1190_v30 = vadd.f32 %v2617_v49, %v890_v17  ;;  %v1197_v17 = vsub.f32 1.0, %v2870_v58  ;;  %v1376_v49 = vadd.f32 %v3591_v60, %v3555_v24  ;;  %v3742_v60 = vstv %s330_s22  ;;  %s2987_s22 = scalar_lea.vmem %s2986_s21, 3072 }
 0x2e0   : > { %v1170_v31 = vpop.f32.mrf.mxu0 }
 0x2e1   : > { %2875 = vtanh.f32 %v1190_v30  ;;  %v1189_v33 = vadd.f32 %v1170_v31, %v885_v29  ;;  %v1200_v31 = vsub.f32 1.0, %v2872_v52 }
 0x2e2   : > { %v2620_v34 = vpop.f32.mrf.mxu0 }
 0x2e3   : > { %2877 = vtanh.f32 %v1189_v33  ;;  %v1192_v41 = vadd.f32 %v2620_v34, %v900_v32  ;;  %v1202_v32 = vmul.f32 %v1198_v63, %v3201_v8 }
 0x2e4   : > { %v1180_v46 = vpop.f32.mrf.mxu0 }
 0x2e5   : > { %2879 = vtanh.f32 %v1192_v41  ;;  %v1191_v48 = vadd.f32 %v1180_v46, %v895_v35  ;;  %v1199_v35 = vsub.f32 1.0, %v2874_v28  ;;  %v1371_v41 = vadd.f32 %v3595_v3, %v3562_v2 }
 0x2e6   : > { %v2657_v7 = vpop.f32.mrf.mxu0  ;;  %v1381_v3 = vadd.f32 %v3601_v26, %v3566_v25 }
 0x2e7   : > { %2881 = vtanh.f32 %v1191_v48  ;;  %v3720_v50 = vadd.f32 %v2657_v7, %v1356_v57  ;;  %v2963_v48 = vld [vmem:[%s3184_s28] sm:$0xff] }
 0x2e8   : > { %v1475_v20 = vpop.f32.mrf.mxu0  ;;  %v1201_v7 = vmul.f32 %v2963_v48, %v1197_v17 }
 0x2e9   : > { %v3724_v44 = vadd.f32 %v1475_v20, %v1351_v14  ;;  %v1386_v20 = vadd.f32 %v3597_v21, %v3547_v27 }
 0x2ea   : > { %v2660_v43 = vpop.f32.mrf.mxu0 }
 0x2eb   : > { %v3728_v61 = vadd.f32 %v2660_v43, %v1366_v42 }
 0x2ec   : > { %v1485_v16 = vpop.f32.mrf.mxu0 }
 0x2ed   : > { %v3733_v56 = vadd.f32 %v1485_v16, %v1361_v11  ;;  %v2964_v16 = vld [vmem:[%s3184_s28 + $0x18] sm:$0xff] }
 0x2ee   : > { %v2876_v29 = vpop.eup %2875  ;;  %v2663_v30 = vpop.f32.mrf.mxu0 }
 0x2ef   : > { %v1206_v0 = vmul.f32 %v2876_v29, %v2868_v40  ;;  %v1543_v33 = vadd.f32 %v2663_v30, %v1376_v49  ;;  %v1204_v49 = vmul.f32 %v2964_v16, %v1200_v31 }
 0x2f0   : > { %v2878_v34 = vpop.eup %2877  ;;  %v1495_v46 = vpop.f32.mrf.mxu0 }
 0x2f1   : > { %v1210_v57 = vadd.f32 %v1206_v0, %v1202_v32  ;;  %v1205_v14 = vmul.f32 %v2878_v34, %v2870_v58  ;;  %v2345_v8 = vmul.f32 -1.442695, %v1543_v33  ;;  %v1542_v42 = vadd.f32 %v1495_v46, %v1371_v41  ;;  %v2965_v58 = vld [vmem:[%s3184_s28 + $0x10] sm:$0xff]  ;;  %v2726_v33 = vpop.f32.mrf.mxu1  ;;  %v2966_v34 = vld [vmem:[%s3184_s28 + $0x8] sm:$0xff] }
 0x2f2   : > { %v2880_v40 = vpop.eup %2879  ;;  %v2666_v43 = vpop.f32.mrf.mxu0  ;;  %v1203_v30 = vmul.f32 %v2965_v58, %v1199_v35 }
 0x2f3   : > { %v1215_v63 = vmul.f32 %v3742_v60, %v1210_v57  ;;  %v1209_v11 = vadd.f32 %v1205_v14, %v1201_v7  ;;  %v1208_v29 = vmul.f32 %v2880_v40, %v2872_v52  ;;  %2883 = vpow2.f32 %v2345_v8 }
 0x2f4   : > { %v2882_v17 = vpop.eup %2881  ;;  %v2344_v32 = vmul.f32 -1.442695, %v1542_v42  ;;  %v1545_v0 = vadd.f32 %v2666_v43, %v1386_v20  ;;  %v1505_v21 = vpop.f32.mrf.mxu0  ;;  %v1856_v14 = vadd.f32 %v3649_v10, %v3547_v27 }
 0x2f5   : > { %v1219_v26 = vadd.f32 %v2966_v34, %v1215_v63  ;;  %v1214_v41 = vmul.f32 %v3742_v60, %v1209_v11  ;;  %v1212_v46 = vadd.f32 %v1208_v29, %v1204_v49  ;;  %v1207_v15 = vmul.f32 %v2882_v17, %v2874_v28  ;;  %v1975_v28 = vpop.f32.mrf.mxu1 }
 0x2f6   : > { %v2347_v57 = vmul.f32 -1.442695, %v1545_v0  ;;  %v1544_v7 = vadd.f32 %v1505_v21, %v1381_v3  ;;  %2885 = vpow2.f32 %v2344_v32  ;;  %v1851_v3 = vadd.f32 %v3660_v18, %v3566_v25 }
 0x2f7   : > { %1223 = vst [vmem:[%s3755_s25 + $0x8] sm:$0xff] %v1219_v26  ;;  %v1218_v52 = vadd.f32 %v2963_v48, %v1214_v41  ;;  %v1217_v31 = vmul.f32 %v3742_v60, %v1212_v46  ;;  %v1211_v35 = vadd.f32 %v1207_v15, %v1203_v30  ;;  %v2015_v42 = vadd.f32 %v2726_v33, %v1856_v14  ;;  %v3768_v33 = vld [vmem:[%s3184_s28 + $0x38] sm:$0xff]  ;;  %v3772_v41 = vld [vmem:[%s3184_s28 + $0x30] sm:$0xff] }
 0x2f8   : > { %2887 = vpow2.f32 %v2347_v57  ;;  %v2346_v8 = vmul.f32 -1.442695, %v1544_v7  ;;  %v2014_v43 = vadd.f32 %v1975_v28, %v1851_v3  ;;  %v3776_v7 = vld [vmem:[%s3184_s28 + $0x28] sm:$0xff]  ;;  %v3786_v14 = vld [vmem:[%s3184_s28 + $0x58] sm:$0xff]  ;;  %v2974_v3 = vld [vmem:[%s3974_s4] sm:$0xff] }
 0x2f9   : > { %1222 = vst [vmem:[%s3755_s25] sm:$0xff] %v1218_v52  ;;  %v1221_v40 = vadd.f32 %v2964_v16, %v1217_v31  ;;  %v1216_v20 = vmul.f32 %v3742_v60, %v1211_v35  ;;  %v2393_v15 = vmul.f32 -1.442695, %v2015_v42  ;;  %v3780_v31 = vld [vmem:[%s3184_s28 + $0x20] sm:$0xff] }
 0x2fa   : > { %2889 = vpow2.f32 %v2346_v8  ;;  %v2392_v63 = vmul.f32 -1.442695, %v2014_v43  ;;  %v3793_v8 = vld [vmem:[%s3184_s28 + $0x50] sm:$0xff]  ;;  %v3809_v42 = vld [vmem:[%s3184_s28 + $0x40] sm:$0xff]  ;;  %v2976_v43 = vld [vmem:[%s3974_s4 + $0x8] sm:$0xff] }
 0x2fb   : > { %1225 = vst [vmem:[%s3755_s25 + $0x18] sm:$0xff] %v1221_v40  ;;  %v1220_v48 = vadd.f32 %v2965_v58, %v1216_v20  ;;  %2891 = vpow2.f32 %v2393_v15  ;;  %v3800_v40 = vld [vmem:[%s3184_s28 + $0x48] sm:$0xff]  ;;  %s2981_s28 = scalar_lea.vmem %s3913_s7, 1536 }
 0x2fc   : > { %2893 = vpow2.f32 %v2392_v63  ;;  %v2977_v63 = vld [vmem:[%s3974_s4 + $0x10] sm:$0xff]  ;;  %p2982_p12 = scmp.ne.s32.totalorder %s3913_s7, %s2981_s28  ;;  %p2989_p2 = scmp.lt.s32.totalorder %s2987_s22, %s2981_s28 }
 0x2fd   : > { %1224 = vst [vmem:[%s3755_s25 + $0x10] sm:$0xff] %v1220_v48 }
 0x2fe   : > { %p2983_p13 = pnand %p2982_p12, %p3154_p4  ;;  %p2990_p3 = por %p2989_p2, %p2988_p1 }
 0x300   : > { %v2884_v11 = vpop.eup %2883  ;;  %p2984_p0 = pneg %p2983_p13 }
 0x301   : > { %v1559_v49 = vadd.f32 1.0, %v2884_v11  ;;  %v2978_v11 = vld [vmem:[%s3974_s4 + $0x18] sm:$0xff] }
 0x302   : > { %p2991_p5 = pnand %p2990_p3, %p2984_p0 }
 0x303   : > { %v2886_v27 = vpop.eup %2885 }
 0x304   : > { %v1558_v17 = vadd.f32 1.0, %v2886_v27  ;;  %v2979_v27 = vld [vmem:[%s3974_s4 + $0x20] sm:$0xff] }
 0x305   : > { %v2888_v10 = vpop.eup %2887 }
 0x306   : > { %v1561_v16 = vadd.f32 1.0, %v2888_v10  ;;  %v2980_v10 = vld [vmem:[%s3974_s4 + $0x28] sm:$0xff] }
 0x307   : > { %v2890_v29 = vpop.eup %2889 }
 0x308   : > { %2895 = vrcp.f32 %v1561_v16  ;;  %v1560_v25 = vadd.f32 1.0, %v2890_v29  ;;  %v2892_v18 = vpop.eup %2891  ;;  %v2340_v16 = vmul.f32 -1.442695, %v3724_v44  ;;  %v2343_v29 = vmul.f32 -1.442695, %v3728_v61 }
 0x309   : > { %2897 = vrcp.f32 %v1559_v49  ;;  %v2894_v58 = vpop.eup %2893  ;;  %v2031_v30 = vadd.f32 1.0, %v2892_v18  ;;  %v2341_v49 = vmul.f32 -1.442695, %v3720_v50  ;;  %v1396_v50 = vadd.f32 %v3605_v38, %v3599_v22  ;;  %v3983_v38 = vld [vmem:[#allocation6_spill] sm:$0xff] }
 0x30a   : > { %2899 = vrcp.f32 %v1560_v25  ;;  %v2030_v32 = vadd.f32 1.0, %v2894_v58  ;;  %v1391_v61 = vadd.f32 %v3607_v39, %v3603_v37  ;;  %v1821_v39 = vadd.f32 %v3622_v62, %v3583_v53 }
 0x30b   : > { %2901 = vrcp.f32 %v1558_v17  ;;  %v2342_v17 = vmul.f32 -1.442695, %v3733_v56 }
 0x30c   : > { %2903 = vrcp.f32 %v2031_v30 }
 0x30d   : > { %2905 = vrcp.f32 %v2030_v32 }
 0x30e   : > { %2907 = vpow2.f32 %v2341_v49  ;;  %v1846_v49 = vadd.f32 %v3631_v4, %v3555_v24 }
 0x30f   : > { %2909 = vpow2.f32 %v2340_v16 }
 0x310   : > { %2911 = vpow2.f32 %v2343_v29 }
 0x311   : > { %2913 = vpow2.f32 %v2342_v17 }
 0x315   : > { %v2896_v0 = vpop.eup %2895 }
 0x316   : > { %v2898_v21 = vpop.eup %2897  ;;  %v1573_v34 = vmul.f32 %v3768_v33, %v2896_v0 }
 0x317   : > { %v2900_v26 = vpop.eup %2899  ;;  %v1571_v52 = vmul.f32 %v3776_v7, %v2898_v21 }
 0x318   : > { %2667 = vmatprep.subr.mxu0 %v1573_v34  ;;  %v1572_v46 = vmul.f32 %v3772_v41, %v2900_v26  ;;  %v2902_v57 = vpop.eup %2901 }
 0x319   : > { %2668 = vmatpush3.msra.mxu0 %v1573_v34  ;;  %v1570_v35 = vmul.f32 %v3780_v31, %v2902_v57  ;;  %v2904_v28 = vpop.eup %2903 }
 0x31a   : > { %2669 = vmatprep.subr.mxu0 %v1572_v46  ;;  %v2906_v20 = vpop.eup %2905  ;;  %v2043_v48 = vmul.f32 %v3786_v14, %v2904_v28 }
 0x31b   : > { %2670 = vmatpush3.msra.mxu0 %v1572_v46  ;;  %v2042_v15 = vmul.f32 %v3793_v8, %v2906_v20  ;;  %v2908_v25 = vpop.eup %2907 }
 0x31c   : > { %2671 = vmatprep.subr.mxu0 %v1571_v52  ;;  %v2910_v18 = vpop.eup %2909  ;;  %v1531_v30 = vadd.f32 1.0, %v2908_v25 }
 0x31d   : > { %2672 = vmatpush3.msra.mxu0 %v1571_v52  ;;  %v2912_v58 = vpop.eup %2911  ;;  %v1530_v0 = vadd.f32 1.0, %v2910_v18 }
 0x31e   : > { %2673 = vmatprep.subr.mxu0 %v1570_v35  ;;  %v2914_v32 = vpop.eup %2913  ;;  %v1533_v21 = vadd.f32 1.0, %v2912_v58  ;;  %2915 = vrcp.f32 %v1531_v30 }
 0x31f   : > { %2674 = vmatpush3.msra.mxu0 %v1570_v35  ;;  %2917 = vrcp.f32 %v1530_v0  ;;  %v1826_v35 = vadd.f32 %v3619_v59, %v3579_v51  ;;  %v1831_v59 = vadd.f32 %v3628_v47, %v3593_v1  ;;  %v1841_v1 = vadd.f32 %v3643_v12, %v3562_v2 }
 0x320   : > { %2676 = vmatmul.mubr.msk.f32.vlgmr.msra.gmra.mxu0 %vm376_vm1, %v3636_v6  ;;  %2707 = vmatprep.subr.mxu0 %v3786_v14  ;;  %2919 = vrcp.f32 %v1533_v21 }
 0x321   : > { %2708 = vmatpush3.msra.mxu0 %v3786_v14  ;;  %2678 = vmatprep.mubr.msk.f32.mxu0 %vm376_vm1, %v3641_v23 }
 0x322   : > { %2709 = vmatprep.subr.mxu0 %v3793_v8 }
 0x323   : > { %2710 = vmatpush3.msra.mxu0 %v3793_v8 }
 0x324   : > { %2679 = vmatmul.mubr.msk.f32.gmra.mxu0 %vm376_vm1, %v3656_v45  ;;  %2711 = vmatprep.subr.mxu0 %v3800_v40 }
 0x325   : > { %2712 = vmatpush3.msra.mxu0 %v3800_v40  ;;  %2715 = vmatprep.mubr.msk.f32.mxu0 %vm376_vm1, %v2974_v3 }
 0x326   : > { %2713 = vmatprep.subr.mxu0 %v3809_v42 }
 0x327   : > { %2714 = vmatpush3.msra.mxu0 %v3809_v42 }
 0x328   : > { %2716 = vmatmul.mubr.msk.f32.vlgmr.msra.gmra.mxu0 %vm376_vm1, %v2976_v43  ;;  %2727 = vmatprep.subr.mxu0 %v2043_v48 }
 0x329   : > { %2728 = vmatpush3.msra.mxu0 %v2043_v48  ;;  %2718 = vmatprep.mubr.msk.f32.mxu0 %vm376_vm1, %v2977_v63 }
 0x32a   : > { %2729 = vmatprep.subr.mxu0 %v2042_v15 }
 0x32b   : > { %2730 = vmatpush3.msra.mxu0 %v2042_v15  ;;  %v2916_v48 = vpop.eup %2915  ;;  %v1836_v15 = vadd.f32 %v3625_v19, %v3589_v54 }
 0x32c   : > { %2719 = vmatmul.mubr.msk.f32.gmra.mxu0 %vm376_vm1, %v2978_v11  ;;  %v2918_v63 = vpop.eup %2917 }
 0x32d   : > { %2721 = vmatprep.mubr.msk.f32.mxu0 %vm376_vm1, %v2979_v27  ;;  %v2920_v51 = vpop.eup %2919  ;;  %v1668_v27 = vsub.f32 1.0, %v2916_v48  ;;  %v1667_v16 = vsub.f32 1.0, %v2918_v63 }
 0x32e   : > { %v1670_v54 = vsub.f32 1.0, %v2920_v51 }
 0x32f   : > { %v1672_v25 = vmul.f32 %v3776_v7, %v1668_v27  ;;  %v1671_v21 = vmul.f32 %v3780_v31, %v1667_v16 }
 0x330   : > { %2722 = vmatmul.mubr.msk.f32.gmra.mxu0 %vm376_vm1, %v2980_v10 }
 0x331   : > { %2735 = vmatprep.mubr.msk.f32.mxu0 %vm376_vm1, %v3537_v13  ;;  %v1532_v13 = vadd.f32 1.0, %v2914_v32 }
 0x333   : > { %2921 = vrcp.f32 %v1532_v13 }
 0x340   : > { %v2922_v62 = vpop.eup %2921 }
 0x341   : > { %v1669_v47 = vsub.f32 1.0, %v2922_v62 }
 0x343   : > { %v1673_v12 = vmul.f32 %v3772_v41, %v1669_v47  ;;  %v3984_v47 = vld [vmem:[#allocation7_spill] sm:$0xff] }
 0x3e0   : > { %v2677_v44 = vpop.f32.mrf.mxu0 }
 0x3e1   : > { %v1660_v56 = vadd.f32 %v2677_v44, %v1396_v50  ;;  %v1674_v50 = vmul.f32 %v3768_v33, %v1670_v54 }
 0x3e2   : > { %v1640_v34 = vpop.f32.mrf.mxu0 }
 0x3e3   : > { %2923 = vtanh.f32 %v1660_v56  ;;  %v1659_v26 = vadd.f32 %v1640_v34, %v1391_v61 }
 0x3e4   : > { %v2680_v46 = vpop.f32.mrf.mxu0 }
 0x3e5   : > { %2925 = vtanh.f32 %v1659_v26  ;;  %v1662_v57 = vadd.f32 %v2680_v46, %v3612_v36 }
 0x3e6   : > { %v1650_v52 = vpop.f32.mrf.mxu0 }
 0x3e7   : > { %2927 = vtanh.f32 %v1662_v57  ;;  %v1661_v28 = vadd.f32 %v1650_v52, %v3983_v38 }
 0x3e8   : > { %v2717_v20 = vpop.f32.mrf.mxu0 }
 0x3e9   : > { %2929 = vtanh.f32 %v1661_v28  ;;  %v3851_v3 = vadd.f32 %v2717_v20, %v1826_v35 }
 0x3ea   : > { %v1945_v43 = vpop.f32.mrf.mxu0 }
 0x3eb   : > { %v3855_v36 = vadd.f32 %v1945_v43, %v1821_v39 }
 0x3ec   : > { %v2720_v11 = vpop.f32.mrf.mxu0 }
 0x3ed   : > { %v3859_v10 = vadd.f32 %v2720_v11, %v1836_v15  ;;  %v2386_v27 = vmul.f32 -1.442695, %v3855_v36 }
 0x3ee   : > { %v1955_v53 = vpop.f32.mrf.mxu0 }
 0x3ef   : > { %v1986_v29 = vadd.f32 %v1955_v53, %v1831_v59  ;;  %v2389_v53 = vmul.f32 -1.442695, %v3859_v10  ;;  %v1861_v10 = vadd.f32 %v3672_v55, %v3603_v37 }
 0x3f0   : > { %v2924_v17 = vpop.eup %2923  ;;  %v2723_v19 = vpop.f32.mrf.mxu0 }
 0x3f1   : > { %v1676_v18 = vmul.f32 %v2924_v17, %v2916_v48  ;;  %v2013_v58 = vadd.f32 %v2723_v19, %v1846_v49 }
 0x3f2   : > { %v2926_v30 = vpop.eup %2925  ;;  %v1965_v32 = vpop.f32.mrf.mxu0 }
 0x3f3   : > { %v1680_v0 = vadd.f32 %v1676_v18, %v1672_v25  ;;  %v1675_v13 = vmul.f32 %v2926_v30, %v2918_v63  ;;  %v2391_v24 = vmul.f32 -1.442695, %v2013_v58  ;;  %v2012_v44 = vadd.f32 %v1965_v32, %v1841_v1 }
 0x3f4   : > { %v2928_v4 = vpop.eup %2927 }
 0x3f5   : > { %v1684_v61 = vmul.f32 %v1680_v0, %v3742_v60  ;;  %v1679_v56 = vadd.f32 %v1675_v13, %v1671_v21  ;;  %v1678_v34 = vmul.f32 %v2928_v4, %v2920_v51  ;;  %2931 = vpow2.f32 %v2391_v24 }
 0x3f6   : > { %v2930_v2 = vpop.eup %2929  ;;  %v2390_v26 = vmul.f32 -1.442695, %v2012_v44 }
 0x3f7   : > { %v1688_v46 = vadd.f32 %v3776_v7, %v1684_v61  ;;  %v1683_v57 = vmul.f32 %v1679_v56, %v3742_v60  ;;  %v1682_v52 = vadd.f32 %v1678_v34, %v1674_v50  ;;  %v1677_v35 = vmul.f32 %v2930_v2, %v2922_v62 }
 0x3f8   : > { %2933 = vpow2.f32 %v2390_v26  ;;  %v2388_v62 = vmul.f32 -1.442695, %v1986_v29 }
 0x3f9   : > { %2353 = vst [vmem:[%s3755_s25 + $0x28] sm:$0xff] %v1688_v46  ;;  %v1687_v38 = vadd.f32 %v3780_v31, %v1683_v57  ;;  %v1686_v28 = vmul.f32 %v1682_v52, %v3742_v60  ;;  %v1681_v20 = vadd.f32 %v1677_v35, %v1673_v12 }
 0x3fb   : > { %2352 = vst [vmem:[%s3755_s25 + $0x20] sm:$0xff] %v1687_v38  ;;  %v1690_v39 = vadd.f32 %v3768_v33, %v1686_v28  ;;  %v1685_v48 = vmul.f32 %v1681_v20, %v3742_v60 }
 0x3fd   : > { %2355 = vst [vmem:[%s3755_s25 + $0x38] sm:$0xff] %v1690_v39  ;;  %v1689_v43 = vadd.f32 %v3772_v41, %v1685_v48  ;;  %v2387_v41 = vmul.f32 -1.442695, %v3851_v3  ;;  %v1866_v3 = vadd.f32 %v3666_v5, %v3599_v22 }
 0x3ff   : > { %2354 = vst [vmem:[%s3755_s25 + $0x30] sm:$0xff] %v1689_v43 }
 0x402   : > { %v2932_v7 = vpop.eup %2931 }
 0x403   : > { %v2029_v15 = vadd.f32 1.0, %v2932_v7 }
 0x405   : > { %v2934_v63 = vpop.eup %2933  ;;  %2935 = vrcp.f32 %v2029_v15 }
 0x406   : > { %v2028_v11 = vadd.f32 1.0, %v2934_v63 }
 0x408   : > { %2937 = vrcp.f32 %v2028_v11 }
 0x409   : > { %2939 = vpow2.f32 %v2387_v41 }
 0x40a   : > { %2941 = vpow2.f32 %v2386_v27 }
 0x40b   : > { %2943 = vpow2.f32 %v2389_v53 }
 0x40c   : > { %2945 = vpow2.f32 %v2388_v62 }
 0x412   : > { %v2936_v51 = vpop.eup %2935 }
 0x413   : > { %v2041_v31 = vmul.f32 %v3800_v40, %v2936_v51 }
 0x415   : > { %v2938_v59 = vpop.eup %2937  ;;  %2731 = vmatprep.subr.mxu0 %v2041_v31 }
 0x416   : > { %2732 = vmatpush3.msra.mxu0 %v2041_v31  ;;  %v2040_v33 = vmul.f32 %v3809_v42, %v2938_v59  ;;  %v2940_v49 = vpop.eup %2939 }
 0x417   : > { %v2942_v16 = vpop.eup %2941 }
 0x418   : > { %2733 = vmatprep.subr.mxu0 %v2040_v33  ;;  %v2944_v17 = vpop.eup %2943 }
 0x419   : > { %2734 = vmatpush3.msra.mxu0 %v2040_v33  ;;  %v2946_v54 = vpop.eup %2945  ;;  %v2003_v19 = vadd.f32 1.0, %v2944_v17 }
 0x41a   : > { %2736 = vmatmul.mubr.msk.f32.vlgmr.msra.gmra.mxu0 %vm376_vm1, %v3636_v6  ;;  %v2001_v6 = vadd.f32 1.0, %v2940_v49 }
 0x41b   : > { %2738 = vmatprep.mubr.msk.f32.mxu0 %vm376_vm1, %v3641_v23  ;;  %v2000_v23 = vadd.f32 1.0, %v2942_v16 }
 0x41c   : > { %2947 = vrcp.f32 %v2001_v6 }
 0x41d   : > { %2949 = vrcp.f32 %v2000_v23 }
 0x41e   : > { %2739 = vmatmul.mubr.msk.f32.gmra.mxu0 %vm376_vm1, %v3656_v45  ;;  %v2002_v45 = vadd.f32 1.0, %v2946_v54  ;;  %2951 = vrcp.f32 %v2003_v19 }
 0x420   : > { %2953 = vrcp.f32 %v2002_v45 }
 0x429   : > { %v2948_v22 = vpop.eup %2947 }
 0x42a   : > { %v2950_v5 = vpop.eup %2949  ;;  %v2138_v0 = vsub.f32 1.0, %v2948_v22 }
 0x42b   : > { %v2952_v21 = vpop.eup %2951  ;;  %v2137_v55 = vsub.f32 1.0, %v2950_v5 }
 0x42c   : > { %v2140_v24 = vsub.f32 1.0, %v2952_v21  ;;  %v2142_v4 = vmul.f32 %v3800_v40, %v2138_v0 }
 0x42d   : > { %v2954_v37 = vpop.eup %2953  ;;  %v2141_v56 = vmul.f32 %v3809_v42, %v2137_v55 }
 0x42e   : > { %v2139_v61 = vsub.f32 1.0, %v2954_v37  ;;  %v2144_v46 = vmul.f32 %v3786_v14, %v2140_v24 }
 0x430   : > { %v2143_v35 = vmul.f32 %v3793_v8, %v2139_v61 }
 0x4da   : > { %v2737_v36 = vpop.f32.mrf.mxu0 }
 0x4db   : > { %v2130_v29 = vadd.f32 %v2737_v36, %v1866_v3 }
 0x4dc   : > { %v2110_v25 = vpop.f32.mrf.mxu0 }
 0x4dd   : > { %2955 = vtanh.f32 %v2130_v29  ;;  %v2129_v18 = vadd.f32 %v2110_v25, %v1861_v10 }
 0x4de   : > { %v2740_v58 = vpop.f32.mrf.mxu0 }
 0x4df   : > { %2957 = vtanh.f32 %v2129_v18  ;;  %v2132_v30 = vadd.f32 %v2740_v58, %v3679_v9 }
 0x4e0   : > { %v2120_v1 = vpop.f32.mrf.mxu0 }
 0x4e1   : > { %2959 = vtanh.f32 %v2132_v30  ;;  %v2131_v32 = vadd.f32 %v2120_v1, %v3984_v47 }
 0x4e3   : > { %2961 = vtanh.f32 %v2131_v32 }
 0x4ea   : > { %v2956_v13 = vpop.eup %2955 }
 0x4eb   : > { %v2146_v50 = vmul.f32 %v2956_v13, %v2948_v22 }
 0x4ec   : > { %v2958_v44 = vpop.eup %2957 }
 0x4ed   : > { %v2150_v9 = vadd.f32 %v2146_v50, %v2142_v4  ;;  %v2145_v34 = vmul.f32 %v2958_v44, %v2950_v5 }
 0x4ee   : > { %v2960_v2 = vpop.eup %2959 }
 0x4ef   : > { %v2154_v12 = vmul.f32 %v2150_v9, %v3742_v60  ;;  %v2149_v26 = vadd.f32 %v2145_v34, %v2141_v56  ;;  %v2148_v57 = vmul.f32 %v2960_v2, %v2952_v21 }
 0x4f0   : > { %v2962_v52 = vpop.eup %2961 }
 0x4f1   : > { %v2158_v38 = vadd.f32 %v3800_v40, %v2154_v12  ;;  %v2153_v28 = vmul.f32 %v2149_v26, %v3742_v60  ;;  %v2152_v20 = vadd.f32 %v2148_v57, %v2144_v46  ;;  %v2147_v39 = vmul.f32 %v2962_v52, %v2954_v37 }
 0x4f3   : > { %2399 = vst [vmem:[%s3755_s25 + $0x48] sm:$0xff] %v2158_v38  ;;  %v2157_v48 = vadd.f32 %v3809_v42, %v2153_v28  ;;  %v2156_v43 = vmul.f32 %v2152_v20, %v3742_v60  ;;  %v2151_v7 = vadd.f32 %v2147_v39, %v2143_v35 }
 0x4f5   : > { %2398 = vst [vmem:[%s3755_s25 + $0x40] sm:$0xff] %v2157_v48  ;;  %v2160_v15 = vadd.f32 %v3786_v14, %v2156_v43  ;;  %v2155_v40 = vmul.f32 %v2151_v7, %v3742_v60 }
 0x4f7   : > { %2401 = vst [vmem:[%s3755_s25 + $0x58] sm:$0xff] %v2160_v15  ;;  %v2159_v63 = vadd.f32 %v3793_v8, %v2155_v40 }
 0x4f9   : > { %2400 = vst [vmem:[%s3755_s25 + $0x50] sm:$0xff] %v2159_v63 }
 0x4fa   : > { %2994 = shalt.err (!%p2991_p5)
}
 0x4fb   : > { %s2995_s23 = scalar_lea.hbm %s3920_s17, 1536  ;;  %s2999_s26 = scalar_lea.hbm %s3978_s8, 3072 }
 0x4fc   : > { %p2996_p6 = scmp.ne.s32.totalorder %s3920_s17, %s2995_s23  ;;  %p3000_p10 = scmp.lt.s32.totalorder %s3920_s17, %s3978_s8 }
 0x4fd   : > { %p3001_p11 = scmp.lt.s32.totalorder %s2999_s26, %s2995_s23 }
 0x4fe   : > { %p2997_p7 = pnand %p2996_p6, %p3154_p4 }
 0x4ff   : > { %p3002_p12 = por %p3001_p11, %p3000_p10 }
 0x500   : > { %p2998_p9 = pneg %p2997_p7 }
 0x502   : > { %p3003_p13 = pnand %p3002_p12, %p2998_p9 }
 0x504   : > { %3006 = shalt.err (!%p3003_p13)
}
 0x505   : > { %s3064_s15 = smov 128   ;;  %s3065_s28 = smov 8  }
 0x506   : > { %2752 = dma.vmem_to_hbm [thread:$0]  (%p3154_p4), %s3913_s7, 1536, %s3920_s17, %s3925_s10, %s3064_s15, %s3064_s15, %s3065_s28  }
 0x507 PF: > { %p2758_p0 = scmp.ge.s32.totalorder %s3057_s12, 2  ;;  %s2196_s20 = sand.u32 1, %s3037_s29  }
 0x508   : > { %s2197_s21 = scalar_lea.sflag [#allocation4], %s2196_s20 }
 0x509   : > { %p2755_p1 = pnand %p2758_p0, %p3161_p8 }
 0x50b   : > { %p2756_p2 = pneg %p2755_p1 }
 0x50d   : > { %3032 = dma.done.wait (%p2756_p2), %s2197_s21, 1536  }
 0x50e   : > { %3034 = vsyncadd (%p2756_p2), %s2197_s21, 4294965760  ;;  %s22_s12 = sadd.s32 1, %s3057_s12   ;;  %s3985_s29 = smov %s3041_s30 }
 0x50f   : > { %p19_p3 = scmp.ge.s32.totalorder %s22_s12, 4   ;;  %s3986_s30 = smov %s3045_s9 }
 0x510   : > { %s3987_s9 = smov %s3167_s19  ;;  %s3988_s10 = smov %s3053_s11 }
 0x511   : > { %s3989_s11 = smov %s3991_s14  ;;  %21 = sbr.rel (!%p19_p3) target bundleno = 6 (0x6), region = 91 }
 0x516   :  { %2202 = vsyncpa [#allocation4], 1 }
 0x517   :  { %2204 = vsyncpa [#allocation4 + $0x1], 1 }

</bundles_post_ra>
